<compile_context>
chip_gen: v7x
topology: tpu7x:2x2x1
jax: 0.10.0
libtpu: 0.0.40
codegen_flags: <defaults>
</compile_context>

<pallas_src>
import jax
import jax.numpy as jnp
from jax.experimental import pallas as pl
from jax.experimental.pallas import tpu as pltpu


def facmac_critic_kernel(
    state_ref, action_ref,
    ws1_ref, bs1_ref,              # stateNet Linear(input_shape, 256)
    ws2_ref, bs2_ref,              # stateNet Linear(256, 128)
    wa1_ref, ba1_ref,              # actionNet Linear(n_action, 128)
    wq1s_ref, wq1a_ref, bq1_ref,   # QNet Linear(256,128) split into state/action halves
    wq2_ref, bq2_ref,              # QNet Linear(128, 128)
    wq3_ref, bq3_ref,              # QNet Linear(128, 1), zero-padded to (128, 128)
    out_ref,
):
    f32 = jnp.float32
    bf16 = jnp.bfloat16
    relu = lambda x: jnp.maximum(x, 0.0)

    # stateNet: Linear -> ReLU -> Linear -> ReLU   (bf16 operands, f32 accumulate)
    s1 = relu(jnp.dot(state_ref[...], ws1_ref[...], preferred_element_type=f32)
              + bs1_ref[...]).astype(bf16)
    s2 = relu(jnp.dot(s1, ws2_ref[...], preferred_element_type=f32)
              + bs2_ref[...]).astype(bf16)

    # actionNet: Linear -> ReLU
    a1 = relu(jnp.dot(action_ref[...], wa1_ref[...], preferred_element_type=f32)
              + ba1_ref[...]).astype(bf16)

    # QNet on cat([s2, a1], dim=1) -- concat fused via the split first-layer weight
    q1 = relu(jnp.dot(s2, wq1s_ref[...], preferred_element_type=f32)
              + jnp.dot(a1, wq1a_ref[...], preferred_element_type=f32)
              + bq1_ref[...]).astype(bf16)
    q2 = relu(jnp.dot(q1, wq2_ref[...], preferred_element_type=f32)
              + bq2_ref[...]).astype(bf16)

    # Final Linear(128, 1) padded to 128 output columns -> lane-dense store.
    q3 = jnp.dot(q2, wq3_ref[...], preferred_element_type=f32) + bq3_ref[...]
    out_ref[...] = q3.astype(out_ref.dtype)


def facmac_critic_forward(state, action, params, *, batch_tile=256):
    """Returns Qval of shape (B, 1), matching FACMACCritic.forward."""
    B, input_shape = state.shape
    _, n_action = action.shape
    (ws1, bs1, ws2, bs2, wa1, ba1, wq1s, wq1a, bq1, wq2, bq2, wq3, bq3) = params

    # Pad ragged batches up to a multiple of the batch tile.
    B_pad = ((B + batch_tile - 1) // batch_tile) * batch_tile
    if B_pad != B:
        pad = B_pad - B
        state = jnp.pad(state, ((0, pad), (0, 0)))
        action = jnp.pad(action, ((0, pad), (0, 0)))

    bf16 = jnp.bfloat16
    state_b = state.astype(bf16)
    action_b = action.astype(bf16)
    ws1b, ws2b, wa1b, wq1sb, wq1ab, wq2b = (
        w.astype(bf16) for w in (ws1, ws2, wa1, wq1s, wq1a, wq2)
    )

    # Zero-pad the final Linear(128 -> 1) to 128 output columns so the output
    # block has a full 128-lane last dim (unmasked vst). Column 0 is real.
    N_OUT = 128
    wq3p = jnp.zeros((wq3.shape[0], N_OUT), jnp.float32).at[:, :1].set(wq3).astype(bf16)
    bq3p = jnp.zeros((1, N_OUT), jnp.float32).at[:, :1].set(bq3)

    num_tiles = B_pad // batch_tile

    def const(shape):
        # weights / biases: same full block at every grid step
        return pl.BlockSpec(shape, lambda i: (0, 0))

    out_padded = pl.pallas_call(
        facmac_critic_kernel,
        out_shape=jax.ShapeDtypeStruct((B_pad, N_OUT), jnp.float32),
        grid_spec=pltpu.PrefetchScalarGridSpec(
            num_scalar_prefetch=0,
            grid=(num_tiles,),
            in_specs=[
                pl.BlockSpec((batch_tile, input_shape), lambda i: (i, 0)),
                pl.BlockSpec((batch_tile, n_action), lambda i: (i, 0)),
                const(ws1b.shape), const(bs1.shape),
                const(ws2b.shape), const(bs2.shape),
                const(wa1b.shape), const(ba1.shape),
                const(wq1sb.shape), const(wq1ab.shape), const(bq1.shape),
                const(wq2b.shape), const(bq2.shape),
                const(wq3p.shape), const(bq3p.shape),
            ],
            out_specs=pl.BlockSpec((batch_tile, N_OUT), lambda i: (i, 0)),
        ),
        compiler_params=pltpu.CompilerParams(
            dimension_semantics=("parallel",),
        ),
    )(state_b, action_b,
      ws1b, bs1, ws2b, bs2, wa1b, ba1,
      wq1sb, wq1ab, bq1, wq2b, bq2, wq3p, bq3p)

    return out_padded[:B, :1]


def init_params(key, input_shape, n_action):
    """Deterministic init mimicking PyTorch Linear default (U(-1/sqrt(fan_in), +))."""
    def linear(key, fan_in, fan_out):
        kw, kb = jax.random.split(key)
        bound = 1.0 / jnp.sqrt(fan_in)
        w = jax.random.uniform(kw, (fan_in, fan_out), jnp.float32, -bound, bound)
        b = jax.random.uniform(kb, (1, fan_out), jnp.float32, -bound, bound)
        return w, b

    keys = jax.random.split(key, 6)
    ws1, bs1 = linear(keys[0], input_shape, 256)   # stateNet[0]
    ws2, bs2 = linear(keys[1], 256, 128)           # stateNet[2]
    wa1, ba1 = linear(keys[2], n_action, 128)      # actionNet[0]
    wq1, bq1 = linear(keys[3], 256, 128)           # QNet[0]
    wq2, bq2 = linear(keys[4], 128, 128)           # QNet[2]
    wq3, bq3 = linear(keys[5], 128, 1)             # QNet[4]

    # split QNet first-layer weight into state-half and action-half (concat fusion)
    wq1s, wq1a = wq1[:128, :], wq1[128:, :]
    return (ws1, bs1, ws2, bs2, wa1, ba1, wq1s, wq1a, bq1, wq2, bq2, wq3, bq3)


def reference_forward(state, action, params):
    """Pure-JAX f32 reference matching the PyTorch module semantics."""
    (ws1, bs1, ws2, bs2, wa1, ba1, wq1s, wq1a, bq1, wq2, bq2, wq3, bq3) = params
    relu = lambda x: jnp.maximum(x, 0.0)
    s = relu(state @ ws1 + bs1)
    s = relu(s @ ws2 + bs2)
    a = relu(action @ wa1 + ba1)
    cat = jnp.concatenate([s, a], axis=1)
    wq1 = jnp.concatenate([wq1s, wq1a], axis=0)
    q = relu(cat @ wq1 + bq1)
    q = relu(q @ wq2 + bq2)
    return q @ wq3 + bq3


if __name__ == "__main__":
    key = jax.random.PRNGKey(0)
    k_params, k_state, k_action = jax.random.split(key, 3)

    batch = 300        # intentionally not a multiple of the tile (tests padding path)
    input_shape = 16   # args.input_shape[agent]
    n_action = 4       # args.n_actions[agent]

    params = init_params(k_params, input_shape, n_action)
    state = jax.random.normal(k_state, (batch, input_shape), jnp.float32)
    action = jax.random.normal(k_action, (batch, n_action), jnp.float32)

    qval = facmac_critic_forward(state, action, params, batch_tile=256)
    qval = jax.block_until_ready(qval)

    ref = reference_forward(state, action, params)
    assert qval.shape == (batch, 1), qval.shape
    # bf16 weights/activations with f32 accumulation -> loosened tolerance.
    assert jnp.allclose(qval, ref, atol=5e-2, rtol=5e-2), (
        float(jnp.max(jnp.abs(qval - ref)))
    )

    print("KERNEL_OK")
</pallas_src>

<mosaic_0001>
module attributes {stable_mosaic.version = 11 : i64} {
  func.func @facmac_critic_kernel(%arg0: i32, %arg1: memref<256x16xbf16, #tpu.memory_space<vmem>>, %arg2: memref<256x4xbf16, #tpu.memory_space<vmem>>, %arg3: memref<16x256xbf16, #tpu.memory_space<vmem>>, %arg4: memref<1x256xf32, #tpu.memory_space<vmem>>, %arg5: memref<256x128xbf16, #tpu.memory_space<vmem>>, %arg6: memref<1x128xf32, #tpu.memory_space<vmem>>, %arg7: memref<4x128xbf16, #tpu.memory_space<vmem>>, %arg8: memref<1x128xf32, #tpu.memory_space<vmem>>, %arg9: memref<128x128xbf16, #tpu.memory_space<vmem>>, %arg10: memref<128x128xbf16, #tpu.memory_space<vmem>>, %arg11: memref<1x128xf32, #tpu.memory_space<vmem>>, %arg12: memref<128x128xbf16, #tpu.memory_space<vmem>>, %arg13: memref<1x128xf32, #tpu.memory_space<vmem>>, %arg14: memref<128x128xbf16, #tpu.memory_space<vmem>>, %arg15: memref<1x128xf32, #tpu.memory_space<vmem>>, %arg16: memref<256x128xf32, #tpu.memory_space<vmem>>) attributes {dimension_semantics = [#tpu.dimension_semantics<parallel>], iteration_bounds = array<i64: 2>, scalar_prefetch = 0 : i64, scratch_operands = 0 : i64, tpu.core_type = #tpu.core_type<tc>, window_params = [{transform_indices = @transform_0, window_bounds = array<i64: 256, 16>}, {transform_indices = @transform_1, window_bounds = array<i64: 256, 4>}, {pipeline_mode = #tpu.pipeline_mode<synchronous>, transform_indices = @transform_2, window_bounds = array<i64: 16, 256>}, {pipeline_mode = #tpu.pipeline_mode<synchronous>, transform_indices = @transform_3, window_bounds = array<i64: 1, 256>}, {pipeline_mode = #tpu.pipeline_mode<synchronous>, transform_indices = @transform_4, window_bounds = array<i64: 256, 128>}, {pipeline_mode = #tpu.pipeline_mode<synchronous>, transform_indices = @transform_5, window_bounds = array<i64: 1, 128>}, {pipeline_mode = #tpu.pipeline_mode<synchronous>, transform_indices = @transform_6, window_bounds = array<i64: 4, 128>}, {pipeline_mode = #tpu.pipeline_mode<synchronous>, transform_indices = @transform_7, window_bounds = array<i64: 1, 128>}, {pipeline_mode = #tpu.pipeline_mode<synchronous>, transform_indices = @transform_8, window_bounds = array<i64: 128, 128>}, {pipeline_mode = #tpu.pipeline_mode<synchronous>, transform_indices = @transform_9, window_bounds = array<i64: 128, 128>}, {pipeline_mode = #tpu.pipeline_mode<synchronous>, transform_indices = @transform_10, window_bounds = array<i64: 1, 128>}, {pipeline_mode = #tpu.pipeline_mode<synchronous>, transform_indices = @transform_11, window_bounds = array<i64: 128, 128>}, {pipeline_mode = #tpu.pipeline_mode<synchronous>, transform_indices = @transform_12, window_bounds = array<i64: 1, 128>}, {pipeline_mode = #tpu.pipeline_mode<synchronous>, transform_indices = @transform_13, window_bounds = array<i64: 128, 128>}, {pipeline_mode = #tpu.pipeline_mode<synchronous>, transform_indices = @transform_14, window_bounds = array<i64: 1, 128>}, {transform_indices = @transform_15, window_bounds = array<i64: 256, 128>}]} {
    %c0 = arith.constant 0 : index
    %c0_0 = arith.constant 0 : index
    %0 = vector.load %arg1[%c0, %c0_0] : memref<256x16xbf16, #tpu.memory_space<vmem>>, vector<256x16xbf16>
    %c0_1 = arith.constant 0 : index
    %c0_2 = arith.constant 0 : index
    %1 = vector.load %arg3[%c0_1, %c0_2] : memref<16x256xbf16, #tpu.memory_space<vmem>>, vector<16x256xbf16>
    %cst = arith.constant dense<0.000000e+00> : vector<256x256xf32>
    %2 = tpu.matmul %0, %1, %cst {dimension_numbers = #tpu.dot_dimension_numbers<[1], [0], [0], [1], [0, 0, 1, 1], [], []>} : vector<256x16xbf16>, vector<16x256xbf16>, vector<256x256xf32> -> vector<256x256xf32>
    %c0_3 = arith.constant 0 : index
    %c0_4 = arith.constant 0 : index
    %3 = vector.load %arg4[%c0_3, %c0_4] : memref<1x256xf32, #tpu.memory_space<vmem>>, vector<1x256xf32>
    %4 = vector.broadcast %3 : vector<1x256xf32> to vector<256x256xf32>
    %5 = arith.addf %2, %4 : vector<256x256xf32>
    %cst_5 = arith.constant 0.000000e+00 : f32
    %6 = vector.broadcast %cst_5 : f32 to vector<256x256xf32>
    %7 = arith.maximumf %5, %6 : vector<256x256xf32>
    %8 = arith.truncf %7 : vector<256x256xf32> to vector<256x256xbf16>
    %c0_6 = arith.constant 0 : index
    %c0_7 = arith.constant 0 : index
    %9 = vector.load %arg5[%c0_6, %c0_7] : memref<256x128xbf16, #tpu.memory_space<vmem>>, vector<256x128xbf16>
    %cst_8 = arith.constant dense<0.000000e+00> : vector<256x128xf32>
    %10 = tpu.matmul %8, %9, %cst_8 {dimension_numbers = #tpu.dot_dimension_numbers<[1], [0], [0], [1], [0, 0, 1, 1], [], []>} : vector<256x256xbf16>, vector<256x128xbf16>, vector<256x128xf32> -> vector<256x128xf32>
    %c0_9 = arith.constant 0 : index
    %c0_10 = arith.constant 0 : index
    %11 = vector.load %arg6[%c0_9, %c0_10] : memref<1x128xf32, #tpu.memory_space<vmem>>, vector<1x128xf32>
    %12 = vector.broadcast %11 : vector<1x128xf32> to vector<256x128xf32>
    %13 = arith.addf %10, %12 : vector<256x128xf32>
    %cst_11 = arith.constant 0.000000e+00 : f32
    %14 = vector.broadcast %cst_11 : f32 to vector<256x128xf32>
    %15 = arith.maximumf %13, %14 : vector<256x128xf32>
    %16 = arith.truncf %15 : vector<256x128xf32> to vector<256x128xbf16>
    %c0_12 = arith.constant 0 : index
    %c0_13 = arith.constant 0 : index
    %17 = vector.load %arg2[%c0_12, %c0_13] : memref<256x4xbf16, #tpu.memory_space<vmem>>, vector<256x4xbf16>
    %c0_14 = arith.constant 0 : index
    %c0_15 = arith.constant 0 : index
    %18 = vector.load %arg7[%c0_14, %c0_15] : memref<4x128xbf16, #tpu.memory_space<vmem>>, vector<4x128xbf16>
    %cst_16 = arith.constant dense<0.000000e+00> : vector<256x128xf32>
    %19 = tpu.matmul %17, %18, %cst_16 {dimension_numbers = #tpu.dot_dimension_numbers<[1], [0], [0], [1], [0, 0, 1, 1], [], []>} : vector<256x4xbf16>, vector<4x128xbf16>, vector<256x128xf32> -> vector<256x128xf32>
    %c0_17 = arith.constant 0 : index
    %c0_18 = arith.constant 0 : index
    %20 = vector.load %arg8[%c0_17, %c0_18] : memref<1x128xf32, #tpu.memory_space<vmem>>, vector<1x128xf32>
    %21 = vector.broadcast %20 : vector<1x128xf32> to vector<256x128xf32>
    %22 = arith.addf %19, %21 : vector<256x128xf32>
    %cst_19 = arith.constant 0.000000e+00 : f32
    %23 = vector.broadcast %cst_19 : f32 to vector<256x128xf32>
    %24 = arith.maximumf %22, %23 : vector<256x128xf32>
    %25 = arith.truncf %24 : vector<256x128xf32> to vector<256x128xbf16>
    %c0_20 = arith.constant 0 : index
    %c0_21 = arith.constant 0 : index
    %26 = vector.load %arg9[%c0_20, %c0_21] : memref<128x128xbf16, #tpu.memory_space<vmem>>, vector<128x128xbf16>
    %cst_22 = arith.constant dense<0.000000e+00> : vector<256x128xf32>
    %27 = tpu.matmul %16, %26, %cst_22 {dimension_numbers = #tpu.dot_dimension_numbers<[1], [0], [0], [1], [0, 0, 1, 1], [], []>} : vector<256x128xbf16>, vector<128x128xbf16>, vector<256x128xf32> -> vector<256x128xf32>
    %c0_23 = arith.constant 0 : index
    %c0_24 = arith.constant 0 : index
    %28 = vector.load %arg10[%c0_23, %c0_24] : memref<128x128xbf16, #tpu.memory_space<vmem>>, vector<128x128xbf16>
    %cst_25 = arith.constant dense<0.000000e+00> : vector<256x128xf32>
    %29 = tpu.matmul %25, %28, %cst_25 {dimension_numbers = #tpu.dot_dimension_numbers<[1], [0], [0], [1], [0, 0, 1, 1], [], []>} : vector<256x128xbf16>, vector<128x128xbf16>, vector<256x128xf32> -> vector<256x128xf32>
    %30 = arith.addf %27, %29 : vector<256x128xf32>
    %c0_26 = arith.constant 0 : index
    %c0_27 = arith.constant 0 : index
    %31 = vector.load %arg11[%c0_26, %c0_27] : memref<1x128xf32, #tpu.memory_space<vmem>>, vector<1x128xf32>
    %32 = vector.broadcast %31 : vector<1x128xf32> to vector<256x128xf32>
    %33 = arith.addf %30, %32 : vector<256x128xf32>
    %cst_28 = arith.constant 0.000000e+00 : f32
    %34 = vector.broadcast %cst_28 : f32 to vector<256x128xf32>
    %35 = arith.maximumf %33, %34 : vector<256x128xf32>
    %36 = arith.truncf %35 : vector<256x128xf32> to vector<256x128xbf16>
    %c0_29 = arith.constant 0 : index
    %c0_30 = arith.constant 0 : index
    %37 = vector.load %arg12[%c0_29, %c0_30] : memref<128x128xbf16, #tpu.memory_space<vmem>>, vector<128x128xbf16>
    %cst_31 = arith.constant dense<0.000000e+00> : vector<256x128xf32>
    %38 = tpu.matmul %36, %37, %cst_31 {dimension_numbers = #tpu.dot_dimension_numbers<[1], [0], [0], [1], [0, 0, 1, 1], [], []>} : vector<256x128xbf16>, vector<128x128xbf16>, vector<256x128xf32> -> vector<256x128xf32>
    %c0_32 = arith.constant 0 : index
    %c0_33 = arith.constant 0 : index
    %39 = vector.load %arg13[%c0_32, %c0_33] : memref<1x128xf32, #tpu.memory_space<vmem>>, vector<1x128xf32>
    %40 = vector.broadcast %39 : vector<1x128xf32> to vector<256x128xf32>
    %41 = arith.addf %38, %40 : vector<256x128xf32>
    %cst_34 = arith.constant 0.000000e+00 : f32
    %42 = vector.broadcast %cst_34 : f32 to vector<256x128xf32>
    %43 = arith.maximumf %41, %42 : vector<256x128xf32>
    %44 = arith.truncf %43 : vector<256x128xf32> to vector<256x128xbf16>
    %c0_35 = arith.constant 0 : index
    %c0_36 = arith.constant 0 : index
    %45 = vector.load %arg14[%c0_35, %c0_36] : memref<128x128xbf16, #tpu.memory_space<vmem>>, vector<128x128xbf16>
    %cst_37 = arith.constant dense<0.000000e+00> : vector<256x128xf32>
    %46 = tpu.matmul %44, %45, %cst_37 {dimension_numbers = #tpu.dot_dimension_numbers<[1], [0], [0], [1], [0, 0, 1, 1], [], []>} : vector<256x128xbf16>, vector<128x128xbf16>, vector<256x128xf32> -> vector<256x128xf32>
    %c0_38 = arith.constant 0 : index
    %c0_39 = arith.constant 0 : index
    %47 = vector.load %arg15[%c0_38, %c0_39] : memref<1x128xf32, #tpu.memory_space<vmem>>, vector<1x128xf32>
    %48 = vector.broadcast %47 : vector<1x128xf32> to vector<256x128xf32>
    %49 = arith.addf %46, %48 : vector<256x128xf32>
    %c0_40 = arith.constant 0 : index
    %c0_41 = arith.constant 0 : index
    %50 = vector.load %arg16[%c0_40, %c0_41] : memref<256x128xf32, #tpu.memory_space<vmem>>, vector<256x128xf32>
    tpu.vector_store %arg16[%c0_40, %c0_41], %49 {strides = array<i32>} : memref<256x128xf32, #tpu.memory_space<vmem>>, vector<256x128xf32>,
    return
  }
  func.func @transform_0(%arg0: i32) -> (i32, i32) {
    %c0_i32 = arith.constant 0 : i32
    %c0_i32_0 = arith.constant 0 : i32
    return %arg0, %c0_i32 : i32, i32
  }
  func.func @transform_1(%arg0: i32) -> (i32, i32) {
    %c0_i32 = arith.constant 0 : i32
    %c0_i32_0 = arith.constant 0 : i32
    return %arg0, %c0_i32 : i32, i32
  }
  func.func @transform_2(%arg0: i32) -> (i32, i32) {
    %c0_i32 = arith.constant 0 : i32
    %c0_i32_0 = arith.constant 0 : i32
    %c0_i32_1 = arith.constant 0 : i32
    return %c0_i32, %c0_i32_0 : i32, i32
  }
  func.func @transform_3(%arg0: i32) -> (i32, i32) {
    %c0_i32 = arith.constant 0 : i32
    %c0_i32_0 = arith.constant 0 : i32
    %c0_i32_1 = arith.constant 0 : i32
    return %c0_i32, %c0_i32_0 : i32, i32
  }
  func.func @transform_4(%arg0: i32) -> (i32, i32) {
    %c0_i32 = arith.constant 0 : i32
    %c0_i32_0 = arith.constant 0 : i32
    %c0_i32_1 = arith.constant 0 : i32
    return %c0_i32, %c0_i32_0 : i32, i32
  }
  func.func @transform_5(%arg0: i32) -> (i32, i32) {
    %c0_i32 = arith.constant 0 : i32
    %c0_i32_0 = arith.constant 0 : i32
    %c0_i32_1 = arith.constant 0 : i32
    return %c0_i32, %c0_i32_0 : i32, i32
  }
  func.func @transform_6(%arg0: i32) -> (i32, i32) {
    %c0_i32 = arith.constant 0 : i32
    %c0_i32_0 = arith.constant 0 : i32
    %c0_i32_1 = arith.constant 0 : i32
    return %c0_i32, %c0_i32_0 : i32, i32
  }
  func.func @transform_7(%arg0: i32) -> (i32, i32) {
    %c0_i32 = arith.constant 0 : i32
    %c0_i32_0 = arith.constant 0 : i32
    %c0_i32_1 = arith.constant 0 : i32
    return %c0_i32, %c0_i32_0 : i32, i32
  }
  func.func @transform_8(%arg0: i32) -> (i32, i32) {
    %c0_i32 = arith.constant 0 : i32
    %c0_i32_0 = arith.constant 0 : i32
    %c0_i32_1 = arith.constant 0 : i32
    return %c0_i32, %c0_i32_0 : i32, i32
  }
  func.func @transform_9(%arg0: i32) -> (i32, i32) {
    %c0_i32 = arith.constant 0 : i32
    %c0_i32_0 = arith.constant 0 : i32
    %c0_i32_1 = arith.constant 0 : i32
    return %c0_i32, %c0_i32_0 : i32, i32
  }
  func.func @transform_10(%arg0: i32) -> (i32, i32) {
    %c0_i32 = arith.constant 0 : i32
    %c0_i32_0 = arith.constant 0 : i32
    %c0_i32_1 = arith.constant 0 : i32
    return %c0_i32, %c0_i32_0 : i32, i32
  }
  func.func @transform_11(%arg0: i32) -> (i32, i32) {
    %c0_i32 = arith.constant 0 : i32
    %c0_i32_0 = arith.constant 0 : i32
    %c0_i32_1 = arith.constant 0 : i32
    return %c0_i32, %c0_i32_0 : i32, i32
  }
  func.func @transform_12(%arg0: i32) -> (i32, i32) {
    %c0_i32 = arith.constant 0 : i32
    %c0_i32_0 = arith.constant 0 : i32
    %c0_i32_1 = arith.constant 0 : i32
    return %c0_i32, %c0_i32_0 : i32, i32
  }
  func.func @transform_13(%arg0: i32) -> (i32, i32) {
    %c0_i32 = arith.constant 0 : i32
    %c0_i32_0 = arith.constant 0 : i32
    %c0_i32_1 = arith.constant 0 : i32
    return %c0_i32, %c0_i32_0 : i32, i32
  }
  func.func @transform_14(%arg0: i32) -> (i32, i32) {
    %c0_i32 = arith.constant 0 : i32
    %c0_i32_0 = arith.constant 0 : i32
    %c0_i32_1 = arith.constant 0 : i32
    return %c0_i32, %c0_i32_0 : i32, i32
  }
  func.func @transform_15(%arg0: i32) -> (i32, i32) {
    %c0_i32 = arith.constant 0 : i32
    %c0_i32_0 = arith.constant 0 : i32
    return %arg0, %c0_i32 : i32, i32
  }
}

</mosaic_0001>

<bundles_post_ra>
// kernel: tpu_custom_call.1
= control target key start
LH: loop header
LB: loop body
LE: loop exit
PB: predicated region body
PF: predicated region fallthrough
CT: control target
= control target key end

     0   :  { %s4470_s0 = inlined_call_operand.vmem [shape: bf16[512,16], index: 0, kind: input, shape index: {}]   ;;  %s4471_s1 = inlined_call_operand.vmem [shape: bf16[512,4], index: 1, kind: input, shape index: {}]   ;;  %s4472_s2 = inlined_call_operand.vmem [shape: bf16[16,256], index: 2, kind: input, shape index: {}]   ;;  %s4473_s3 = inlined_call_operand.vmem [shape: f32[1,256], index: 3, kind: input, shape index: {}]   ;;  %s4474_s4 = inlined_call_operand.vmem [shape: bf16[256,128], index: 4, kind: input, shape index: {}]   ;;  %s4475_s5 = inlined_call_operand.vmem [shape: f32[1,128], index: 5, kind: input, shape index: {}]   ;;  %s4476_s6 = inlined_call_operand.vmem [shape: bf16[4,128], index: 6, kind: input, shape index: {}]   ;;  %s4477_s7 = inlined_call_operand.vmem [shape: f32[1,128], index: 7, kind: input, shape index: {}]   ;;  %s4478_s8 = inlined_call_operand.vmem [shape: bf16[128,128], index: 8, kind: input, shape index: {}]   ;;  %s4479_s9 = inlined_call_operand.vmem [shape: bf16[128,128], index: 9, kind: input, shape index: {}]   ;;  %s4480_s10 = inlined_call_operand.vmem [shape: f32[1,128], index: 10, kind: input, shape index: {}]   ;;  %s4481_s11 = inlined_call_operand.vmem [shape: bf16[128,128], index: 11, kind: input, shape index: {}]   ;;  %s4482_s12 = inlined_call_operand.vmem [shape: f32[1,128], index: 12, kind: input, shape index: {}]   ;;  %s4483_s13 = inlined_call_operand.vmem [shape: bf16[128,128], index: 13, kind: input, shape index: {}]   ;;  %s4484_s14 = inlined_call_operand.vmem [shape: f32[1,128], index: 14, kind: input, shape index: {}]   ;;  %s4485_s15 = inlined_call_operand.hbm [shape: f32[512,128], index: 15, kind: output, shape index: {}]  }
   0x1   :  { %4487 = sst [smem:[#allocation7_spill]] %s4470_s0 }
   0x2   :  { %4488 = sst [smem:[#allocation8_spill]] %s4472_s2 }
   0x3   :  { %20 = vsyncpa [#allocation3], 0 }
   0x4   :  { %22 = vsyncpa [#allocation3 + $0x1], 0  ;;  %s3781_s18 = smov 0   ;;  %s3783_s19 = smov 0  }
   0x5   :  { %s3785_s20 = smov 0   ;;  %s3787_s21 = smov 0  }
   0x6 LB: > { %4489 = sst [smem:[#allocation5_spill]] %s3691_s20  ;;  %s3802_s22 = sadd.s32 4294967295, %s3695_s21   ;;  %s3695_s21 = sphi %s3787_s21, %s4499_s21   ;;  %s3691_s20 = sphi %s3785_s20, %s4496_s20   ;;  %s3687_s19 = sphi %s3783_s19, %s4498_s19   ;;  %s3683_s18 = sphi %s3781_s18, %s4497_s18  }
   0x7   : > { %s2888_s23 = sadd.s32 4294967294, %s3695_s21   ;;  %s3806_s24 = sadd.s32 1, %s3695_s21  }
   0x8   : > { %s360_s25 = sadd.s32 1, %s3691_s20  ;;  %s357_s26 = ssub.s32 %s3695_s21, %s3806_s24 }
   0x9   : > { %p370_p0 = scmp.ne.s32.totalorder %s3691_s20, %s3687_s19  ;;  %p358_p1 = scmp.eq.s32.totalorder %s357_s26, 0 }
   0xa   : > { %p371_p2 = scmp.eq.s32.totalorder %s3802_s22, 1  ;;  %p376_p3 = scmp.ne.s32.totalorder %s3687_s19, %s3683_s18 }
   0xb   : > { %p377_p4 = scmp.eq.s32.totalorder %s2888_s23, 1  ;;  %p2891_p7 = scmp.ge.s32.totalorder %s3695_s21, 1 }
   0xc   : > { %s3817_s27 = scalar_select %p358_p1, %s3691_s20, %s360_s25  }
   0xd   : > { %p3819_p5 = por %p371_p2, %p370_p0  ;;  %p3823_p6 = por %p377_p4, %p376_p3 }
   0xe   : > { %4490 = sst [smem:[#allocation6_spill]] %s3817_s27  ;;  %p452_p8 = scmp.lt.s32.totalorder %s3695_s21, 3 }
  0x10   : > { %p453_p9 = pnand %p2891_p7, %p452_p8 }
  0x11   : > { %s4493_s2 = sld [smem:[#allocation8_spill]] (!%p453_p9)  ;;  %s2893_s17 = sshll.u32 (!%p453_p9), %s3802_s22, 5  ;;  %v3697_v2 = vmov (!%p453_p9), 0   ;;  %v1369_v3 = vld [vmem:[%s4476_s6] sm:$0x3] (!%p453_p9)  ;;  %vm1506_vm0 = vcmask (!%p453_p9), 1041408   ;;  %v555_v54 = vlaneseq (!%p453_p9) }
  0x12   : > { %456 = sbr.rel (%p453_p9) target bundleno = 1270 (0x4f6), region = 80  ;;  %736 = vmatprep.mubr.bf16.mxu0 (!%p453_p9), %v3697_v2  ;;  %p506_p10 = scmp.lt.s32.totalorder (!%p453_p9), %s2893_s17, 63  ;;  %856 = vmatprep.mubr.bf16.mxu1 (!%p453_p9), %v3697_v2  ;;  %v3575_v4 = vld [vmem:[%s4474_s4 + $0x40] sm:$0xff] (!%p453_p9)   ;;  %vm655_vm1 = vcmask (!%p453_p9), 130048   ;;  %v1508_v6 = vsel (!%p453_p9), %vm1506_vm0, %v1369_v3, 0  ;;  %v3579_v9 = vld [vmem:[%s4474_s4 + $0x48] sm:$0xff] (!%p453_p9)  }
  0x13   : > { %s4494_s0 = sld [smem:[#allocation7_spill]] (!%p453_p9)  ;;  %v3577_v8 = vld [vmem:[%s4474_s4] sm:$0xff] (!%p453_p9)   ;;  %v3580_v12 = vld [vmem:[%s4474_s4 + $0x8] sm:$0xff] (!%p453_p9)   ;;  %v3581_v15 = vld [vmem:[%s4474_s4 + $0x50] sm:$0xff] (!%p453_p9)   ;;  %vm1457_vm2 = vcmask (!%p453_p9), 31744   ;;  %v556_v55 = vshrl.u32 (!%p453_p9), %v555_v54, 7 }
  0x14   : > { %v3583_v17 = vld [vmem:[%s4474_s4 + $0x10] sm:$0xff] (!%p453_p9)   ;;  %v3585_v19 = vld [vmem:[%s4474_s4 + $0x58] sm:$0xff] (!%p453_p9)   ;;  %v3587_v21 = vld [vmem:[%s4474_s4 + $0x60] sm:$0xff] (!%p453_p9)   ;;  %s3698_s16 = smov (!%p453_p9), [#allocation2]  }
  0x15   : > { %v3586_v20 = vld [vmem:[%s4474_s4 + $0x18] sm:$0xff] (!%p453_p9)   ;;  %v3589_v22 = vld [vmem:[%s4474_s4 + $0x20] sm:$0xff] (!%p453_p9)   ;;  %v3591_v24 = vld [vmem:[%s4474_s4 + $0x68] sm:$0xff] (!%p453_p9)   ;;  %v557_v56 = vsub.s32 (!%p453_p9), 0, %v556_v55  ;;  %v561_v58 = vsub.s32 (!%p453_p9), 1, %v556_v55 }
  0x16   : > { %v3592_v25 = vld [vmem:[%s4474_s4 + $0x28] sm:$0xff] (!%p453_p9)   ;;  %v3593_v33 = vld [vmem:[%s4474_s4 + $0x70] sm:$0xff] (!%p453_p9)   ;;  %v3597_v36 = vld [vmem:[%s4474_s4 + $0x78] sm:$0xff] (!%p453_p9)  }
  0x17   : > { %v3550_v0 = vld [vmem:[%s4493_s2 + $0x4] ss:$8 sps:$4 sm:$0xff] (!%p453_p9)   ;;  %v3552_v1 = vld [vmem:[%s4493_s2] ss:$8 sps:$4 sm:$0xff] (!%p453_p9)   ;;  %v3595_v35 = vld [vmem:[%s4474_s4 + $0x30] sm:$0xff] (!%p453_p9)  }
  0x18   : > { %704 = vmatprep.subr.bf16.mxu0 (!%p453_p9), %v3550_v0  ;;  %3473 = vmatprep.subr.bf16.mxu1 (!%p453_p9), %v3550_v0  ;;  %v3598_v37 = vld [vmem:[%s4474_s4 + $0x38] sm:$0xff] (!%p453_p9)   ;;  %v3601_v53 = vld [vmem:[%s4479_s9] sm:$0xff] (!%p453_p9)  }
  0x19   : > { %705 = vmatpush1.bf16.msra.mxu0 %v3552_v1  ;;  %s4501_s17 = smov (!%p506_p10, %s2893_s17), 63  ;;  %3474 = vmatpush1.bf16.msra.mxu1 %v3552_v1  ;;  %v553_v57 = vld [vmem:[%s4473_s3] sm:$0x3] }
  0x1a   : > { %3507 = vmatprep.subr.msk.bf16.mxu0 %vm1506_vm0, %v1369_v3  ;;  %s2894_s23 = sshll.u32 %s4501_s17, 2  ;;  %3022 = vmatprep.subr.bf16.mxu1 %v3575_v4  ;;  %v3983_v59 = vrot.slane %v553_v57, %v557_v56  ;;  %v3985_v60 = vrot.slane %v553_v57, %v561_v58  ;;  %v3605_v55 = vld [vmem:[%s4479_s9 + $0x20] sm:$0xff]  }
  0x1b   : > { %s3847_s20 = scalar_lea.vmem %s4494_s0, %s2894_s23  ;;  %s3868_s25 = scalar_lea.vmem %s4471_s1, %s2894_s23 }
  0x1c   : > { %v3553_v5 = vld [vmem:[%s3847_s20] sm:$0xff]   ;;  %v3554_v7 = vld [vmem:[%s3847_s20 + $0x8] sm:$0xff]   ;;  %v3555_v11 = vld [vmem:[%s3847_s20 + $0x10] sm:$0xff]   ;;  %s3021_s0 = sshll.u32 %s3802_s22, 12 }
  0x1d   : > { %2915 = vmatmul.mubr.msk.bf16.vlgmr.msra.gmra.mrb[0].mxu0 %vm655_vm1, %v3553_v5  ;;  %v3565_v10 = vld [vmem:[%s3847_s20 + $0x60] sm:$0xff]   ;;  %v3566_v13 = vld [vmem:[%s3847_s20 + $0x68] sm:$0xff]   ;;  %v3556_v14 = vld [vmem:[%s3847_s20 + $0x18] sm:$0xff]   ;;  %s4419_s26 = scalar_lea.hbm %s4485_s15, %s3021_s0 }
  0x1e   : > { %746 = vmatprep.mubr.bf16.mxu0 %v3697_v2  ;;  %3248 = vmatpush3.bf16.msra.mxu0 %v1508_v6  ;;  %v3567_v16 = vld [vmem:[%s3847_s20 + $0x70] sm:$0xff]   ;;  %v3557_v18 = vld [vmem:[%s3847_s20 + $0x20] sm:$0xff]   ;;  %v3568_v23 = vld [vmem:[%s3847_s20 + $0x78] sm:$0xff]  }
  0x1f   : > { %2927 = vmatmul.mubr.msk.bf16.vlgmr.msra.gmra.mrb[0].mxu1 %vm655_vm1, %v3565_v10  ;;  %v3558_v26 = vld [vmem:[%s3847_s20 + $0x28] sm:$0xff]   ;;  %v3559_v27 = vld [vmem:[%s3847_s20 + $0x30] sm:$0xff]   ;;  %v3560_v28 = vld [vmem:[%s3847_s20 + $0x38] sm:$0xff]  }
  0x20   : > { %866 = vmatprep.mubr.bf16.mxu1 %v3697_v2  ;;  %3023 = vmatpush3.bf16.msra.mxu1 %v3577_v8  ;;  %v3561_v29 = vld [vmem:[%s3847_s20 + $0x40] sm:$0xff]   ;;  %v3562_v30 = vld [vmem:[%s3847_s20 + $0x48] sm:$0xff]   ;;  %v3563_v31 = vld [vmem:[%s3847_s20 + $0x50] sm:$0xff]  }
  0x21   : > { %3024 = vmatprep.subr.bf16.mxu1 %v3579_v9  ;;  %v3564_v32 = vld [vmem:[%s3847_s20 + $0x58] sm:$0xff]   ;;  %v3569_v34 = vld [vmem:[%s3868_s25] sm:$0xff]   ;;  %v3570_v38 = vld [vmem:[%s3868_s25 + $0x8] sm:$0xff]   ;;  %s3637_s20 = sshll.u32 %s3698_s16, 4  ;;  %s3638_s20 = int_to_ptr.vmem [resolvable:$false] %s3637_s20 }
  0x22   : > { %v3571_v39 = vld [vmem:[%s3868_s25 + $0x10] sm:$0xff]   ;;  %v3572_v40 = vld [vmem:[%s3868_s25 + $0x18] sm:$0xff]   ;;  %v3573_v41 = vld [vmem:[%s3868_s25 + $0x20] sm:$0xff]   ;;  %s3639_s0 = scalar_lea.vmem %s3638_s20, 8192 }
  0x23   : > { %v3574_v42 = vld [vmem:[%s3868_s25 + $0x28] sm:$0xff]   ;;  %v3576_v43 = vld [vmem:[%s3868_s25 + $0x30] sm:$0xff]   ;;  %v3578_v44 = vld [vmem:[%s3868_s25 + $0x38] sm:$0xff]  }
  0x24   : > { %3025 = vmatpush3.bf16.msra.mxu1 %v3580_v12  ;;  %v3582_v45 = vld [vmem:[%s3868_s25 + $0x40] sm:$0xff]   ;;  %v3584_v46 = vld [vmem:[%s3868_s25 + $0x48] sm:$0xff]   ;;  %v3588_v47 = vld [vmem:[%s3868_s25 + $0x50] sm:$0xff]  }
  0x25   : > { %2916 = vmatmul.mubr.msk.bf16.gmra.mrb[4].mxu0 %vm655_vm1, %v3554_v7  ;;  %3026 = vmatprep.subr.bf16.mxu1 %v3581_v15  ;;  %v3590_v48 = vld [vmem:[%s3868_s25 + $0x58] sm:$0xff]   ;;  %v3594_v49 = vld [vmem:[%s3868_s25 + $0x60] sm:$0xff]   ;;  %v3596_v50 = vld [vmem:[%s3868_s25 + $0x68] sm:$0xff]  }
  0x26   : > { %756 = vmatprep.mubr.bf16.mxu0 %v3697_v2  ;;  %v3599_v51 = vld [vmem:[%s3868_s25 + $0x70] sm:$0xff]   ;;  %v3600_v52 = vld [vmem:[%s3868_s25 + $0x78] sm:$0xff]   ;;  %s502_s25 = sand.u32 1, %s3687_s19  }
  0x27   : > { %2928 = vmatmul.mubr.msk.bf16.gmra.mrb[4].mxu1 %vm655_vm1, %v3566_v13  ;;  %s2892_s30 = sshll.u32 %s502_s25, 8  ;;  %s4429_s22 = scalar_lea.sflag [#allocation3], %s502_s25 }
  0x28   : > { %876 = vmatprep.mubr.bf16.mxu1 %v3697_v2  ;;  %3027 = vmatpush3.bf16.msra.mxu1 %v3583_v17  ;;  %s4354_s27 = scalar_lea.vmem [#allocation2], %s2892_s30 }
  0x29   : > { %3028 = vmatprep.subr.bf16.mxu1 %v3585_v19  ;;  %s2814_s2 = sshll.u32 %s4354_s27, 4  ;;  %s4421_s2 = int_to_ptr.vmem [resolvable:$true] %s2814_s2 }
  0x2a   : > { %s3633_s30 = scalar_lea.vmem %s4421_s2, 4096  ;;  %p3640_p0 = scmp.lt.s32.totalorder %s4421_s2, %s3638_s20 }
  0x2b   : > { %p3634_p11 = scmp.ne.s32.totalorder %s4421_s2, %s3633_s30  ;;  %p3641_p1 = scmp.lt.s32.totalorder %s3639_s0, %s3633_s30 }
  0x2c   : > { %3029 = vmatpush3.bf16.msra.mxu1 %v3586_v20 }
  0x2d   : > { %2917 = vmatmul.mubr.msk.bf16.gmra.mrb[8].mxu0 %vm655_vm1, %v3555_v11  ;;  %3030 = vmatprep.subr.bf16.mxu1 %v3587_v21  ;;  %p3635_p12 = pnand %p3634_p11, %p3819_p5  ;;  %p3642_p2 = por %p3641_p1, %p3640_p0 }
  0x2e   : > { %766 = vmatprep.mubr.bf16.mxu0 %v3697_v2 }
  0x2f   : > { %2929 = vmatmul.mubr.msk.bf16.gmra.mrb[8].mxu1 %vm655_vm1, %v3567_v16  ;;  %p3636_p13 = pneg %p3635_p12 }
  0x30   : > { %886 = vmatprep.mubr.bf16.mxu1 %v3697_v2  ;;  %3031 = vmatpush3.bf16.msra.mxu1 %v3589_v22 }
  0x31   : > { %3032 = vmatprep.subr.bf16.mxu1 %v3591_v24  ;;  %p3643_p3 = pnand %p3642_p2, %p3636_p13 }
  0x34   : > { %3033 = vmatpush3.bf16.msra.mxu1 %v3592_v25  ;;  %v3603_v25 = vld [vmem:[%s4479_s9 + $0x10] sm:$0xff]  }
  0x35   : > { %2918 = vmatmul.mubr.msk.bf16.gmra.mrb[12].mxu0 %vm655_vm1, %v3556_v14  ;;  %3034 = vmatprep.subr.bf16.mxu1 %v3593_v33  ;;  %v3602_v14 = vld [vmem:[%s4479_s9 + $0x8] sm:$0xff]  }
  0x36   : > { %776 = vmatprep.mubr.bf16.mxu0 %v3697_v2 }
  0x37   : > { %2930 = vmatmul.mubr.msk.bf16.gmra.mrb[12].mxu1 %vm655_vm1, %v3568_v23 }
  0x38   : > { %3035 = vmatpush3.bf16.msra.mxu1 %v3595_v35 }
  0x39   : > { %3036 = vmatprep.subr.bf16.mxu1 %v3597_v36 }
  0x3c   : > { %3037 = vmatpush3.bf16.msra.mxu1 %v3598_v37 }
  0x3d   : > { %2919 = vmatmul.mubr.msk.bf16.gmra.mrb[16].mxu0 %vm655_vm1, %v3557_v18  ;;  %3281 = vmatprep.subr.bf16.mxu1 %v3601_v53 }
  0x3e   : > { %786 = vmatprep.mubr.bf16.mxu0 %v3697_v2 }
  0x45   : > { %2920 = vmatmul.mubr.msk.bf16.gmra.mrb[20].mxu0 %vm655_vm1, %v3558_v26 }
  0x46   : > { %796 = vmatprep.mubr.bf16.mxu0 %v3697_v2 }
  0x4d   : > { %2921 = vmatmul.mubr.msk.bf16.gmra.mrb[24].mxu0 %vm655_vm1, %v3559_v27 }
  0x4e   : > { %806 = vmatprep.mubr.bf16.mxu0 %v3697_v2 }
  0x55   : > { %2922 = vmatmul.mubr.msk.bf16.gmra.mrb[28].mxu0 %vm655_vm1, %v3560_v28 }
  0x56   : > { %816 = vmatprep.mubr.bf16.mxu0 %v3697_v2 }
  0x5d   : > { %2923 = vmatmul.mubr.msk.bf16.gmra.mrb[32].mxu0 %vm655_vm1, %v3561_v29 }
  0x5e   : > { %826 = vmatprep.mubr.bf16.mxu0 %v3697_v2 }
  0x65   : > { %2924 = vmatmul.mubr.msk.bf16.gmra.mrb[36].mxu0 %vm655_vm1, %v3562_v30 }
  0x66   : > { %836 = vmatprep.mubr.bf16.mxu0 %v3697_v2 }
  0x6d   : > { %2925 = vmatmul.mubr.msk.bf16.gmra.mrb[40].mxu0 %vm655_vm1, %v3563_v31 }
  0x6e   : > { %846 = vmatprep.mubr.bf16.mxu0 %v3697_v2 }
  0x75   : > { %2926 = vmatmul.mubr.msk.bf16.gmra.mrb[44].mxu0 %vm655_vm1, %v3564_v32 }
  0x76   : > { %3249 = vmatprep.mubr.msk.bf16.mxu0 %vm1457_vm2, %v3569_v34 }
  0x7d   : > { %3250 = vmatmul.mubr.msk.bf16.vlgmr.msra.gmra.mrb[48].mxu0 %vm1457_vm2, %v3570_v38 }
  0x7e   : > { %3253 = vmatprep.mubr.msk.bf16.mxu0 %vm1457_vm2, %v3571_v39 }
  0x85   : > { %3254 = vmatmul.mubr.msk.bf16.gmra.mrb[52].mxu0 %vm1457_vm2, %v3572_v40 }
  0x86   : > { %3257 = vmatprep.mubr.msk.bf16.mxu0 %vm1457_vm2, %v3573_v41  ;;  %v3604_v41 = vld [vmem:[%s4479_s9 + $0x18] sm:$0xff]  }
  0x8d   : > { %3258 = vmatmul.mubr.msk.bf16.gmra.mrb[56].mxu0 %vm1457_vm2, %v3574_v42 }
  0x8e   : > { %3261 = vmatprep.mubr.msk.bf16.mxu0 %vm1457_vm2, %v3576_v43 }
  0x95   : > { %3262 = vmatmul.mubr.msk.bf16.gmra.mrb[60].mxu0 %vm1457_vm2, %v3578_v44 }
  0x96   : > { %3265 = vmatprep.mubr.msk.bf16.mxu0 %vm1457_vm2, %v3582_v45 }
  0x9d   : > { %3266 = vmatmul.mubr.msk.bf16.gmra.mrb[64].mxu0 %vm1457_vm2, %v3584_v46 }
  0x9e   : > { %3269 = vmatprep.mubr.msk.bf16.mxu0 %vm1457_vm2, %v3588_v47 }
  0xa5   : > { %3270 = vmatmul.mubr.msk.bf16.gmra.mrb[68].mxu0 %vm1457_vm2, %v3590_v48 }
  0xa6   : > { %3273 = vmatprep.mubr.msk.bf16.mxu0 %vm1457_vm2, %v3594_v49 }
  0xad   : > { %3274 = vmatmul.mubr.msk.bf16.gmra.mrb[72].mxu0 %vm1457_vm2, %v3596_v50 }
  0xae   : > { %3277 = vmatprep.mubr.msk.bf16.mxu0 %vm1457_vm2, %v3599_v51 }
  0xb5   : > { %3278 = vmatmul.mubr.msk.bf16.gmra.mrb[76].mxu0 %vm1457_vm2, %v3600_v52 }
  0xf0   : > { %v738_v61 = vpop.f32.mrb[0].mxu0 }
  0xf1   : > { %v739_v62 = vadd.f32 %v738_v61, %v3983_v59  ;;  %v740_v63 = vpop.f32.mrb[1].mxu0 }
  0xf2   : > { %v741_v0 = vadd.f32 %v740_v63, %v3985_v60  ;;  %v742_v1 = vpop.f32.mrb[2].mxu0  ;;  %v858_v20 = vpop.f32.mrb[0].mxu1 }
  0xf3   : > { %v743_v2 = vadd.f32 %v742_v1, %v3983_v59  ;;  %v744_v3 = vpop.f32.mrb[3].mxu0  ;;  %v897_v5 = vmax.f32 %v739_v62, 0.0  ;;  %v859_v23 = vadd.f32 %v858_v20, %v3983_v59  ;;  %v860_v24 = vpop.f32.mrb[1].mxu1 }
  0xf4   : > { %v745_v4 = vadd.f32 %v744_v3, %v3985_v60  ;;  %v898_v7 = vmax.f32 %v741_v0, 0.0  ;;  %v861_v28 = vadd.f32 %v860_v24, %v3985_v60  ;;  %v862_v29 = vpop.f32.mrb[2].mxu1 }
  0xf5   : > { %v899_v6 = vmax.f32 %v743_v2, 0.0  ;;  %v945_v31 = vmax.f32 %v859_v23, 0.0  ;;  %v863_v32 = vadd.f32 %v862_v29, %v3983_v59  ;;  %v864_v33 = vpop.f32.mrb[3].mxu1  ;;  %v3607_v23 = vld [vmem:[%s4479_s9 + $0x30] sm:$0xff]  }
  0xf6   : > { %v900_v8 = vmax.f32 %v745_v4, 0.0  ;;  %v946_v36 = vmax.f32 %v861_v28, 0.0  ;;  %v865_v37 = vadd.f32 %v864_v33, %v3985_v60 }
  0xf7   : > { %v961_v9 = vpack.c.bf16 %v899_v6, %v897_v5  ;;  %v947_v40 = vmax.f32 %v863_v32, 0.0 }
  0xf8   : > { %v962_v10 = vpack.c.bf16 %v900_v8, %v898_v7  ;;  %v748_v11 = vpop.f32.mrb[4].mxu0  ;;  %v948_v44 = vmax.f32 %v865_v37, 0.0 }
  0xf9   : > { %v749_v12 = vadd.f32 %v748_v11, %v3983_v59  ;;  %v750_v13 = vpop.f32.mrb[5].mxu0  ;;  %v4011_v47 = vpack.c.bf16 %v947_v40, %v945_v31 }
  0xfa   : > { %v751_v15 = vadd.f32 %v750_v13, %v3985_v60  ;;  %v752_v16 = vpop.f32.mrb[6].mxu0  ;;  %1160 = vmatprep.mubr.bf16.mxu1 %v962_v10  ;;  %v4014_v49 = vpack.c.bf16 %v948_v44, %v946_v36  ;;  %v868_v50 = vpop.f32.mrb[4].mxu1 }
  0xfb   : > { %v753_v17 = vadd.f32 %v752_v16, %v3983_v59  ;;  %v754_v18 = vpop.f32.mrb[7].mxu0  ;;  %1161 = vmatmul.mubr.bf16.vlgmr.msra.gmra.mrb[16].mxu1 %v961_v9  ;;  %v901_v21 = vmax.f32 %v749_v12, 0.0  ;;  %v870_v54 = vpop.f32.mrb[5].mxu1  ;;  %v3606_v9 = vld [vmem:[%s4479_s9 + $0x28] sm:$0xff]  }
  0xfc   : > { %v755_v19 = vadd.f32 %v754_v18, %v3985_v60  ;;  %3282 = vmatpush3.bf16.msra.mxu1 %v3601_v53  ;;  %v902_v26 = vmax.f32 %v751_v15, 0.0  ;;  %v869_v53 = vadd.f32 %v868_v50, %v3983_v59  ;;  %v871_v58 = vadd.f32 %v870_v54, %v3985_v60  ;;  %v872_v61 = vpop.f32.mrb[6].mxu1 }
  0xfd   : > { %v903_v22 = vmax.f32 %v753_v17, 0.0  ;;  %3283 = vmatprep.subr.bf16.mxu1 %v3602_v14  ;;  %v873_v0 = vadd.f32 %v872_v61, %v3983_v59  ;;  %v874_v1 = vpop.f32.mrb[7].mxu1 }
  0xfe   : > { %v904_v27 = vmax.f32 %v755_v19, 0.0  ;;  %v949_v63 = vmax.f32 %v869_v53, 0.0  ;;  %v950_v4 = vmax.f32 %v871_v58, 0.0  ;;  %v875_v5 = vadd.f32 %v874_v1, %v3985_v60 }
  0xff   : > { %v963_v30 = vpack.c.bf16 %v903_v22, %v901_v21  ;;  %v951_v8 = vmax.f32 %v873_v0, 0.0 }
 0x100   : > { %v964_v34 = vpack.c.bf16 %v904_v27, %v902_v26  ;;  %v758_v35 = vpop.f32.mrb[8].mxu0  ;;  %3284 = vmatpush3.bf16.msra.mxu1 %v3602_v14  ;;  %v952_v12 = vmax.f32 %v875_v5, 0.0 }
 0x101   : > { %v759_v38 = vadd.f32 %v758_v35, %v3983_v59  ;;  %v760_v39 = vpop.f32.mrb[9].mxu0  ;;  %3285 = vmatprep.subr.bf16.mxu1 %v3603_v25  ;;  %v4029_v15 = vpack.c.bf16 %v951_v8, %v949_v63 }
 0x102   : > { %v761_v42 = vadd.f32 %v760_v39, %v3985_v60  ;;  %v762_v43 = vpop.f32.mrb[10].mxu0  ;;  %1168 = vmatprep.mubr.bf16.mxu1 %v964_v34  ;;  %v4032_v17 = vpack.c.bf16 %v952_v12, %v950_v4  ;;  %v878_v18 = vpop.f32.mrb[8].mxu1  ;;  %v3608_v39 = vld [vmem:[%s4479_s9 + $0x38] sm:$0xff]  }
 0x103   : > { %v763_v45 = vadd.f32 %v762_v43, %v3983_v59  ;;  %v764_v46 = vpop.f32.mrb[11].mxu0  ;;  %1169 = vmatmul.mubr.bf16.gmra.mrb[20].mxu1 %v963_v30  ;;  %v905_v51 = vmax.f32 %v759_v38, 0.0  ;;  %v879_v21 = vadd.f32 %v878_v18, %v3983_v59  ;;  %v880_v22 = vpop.f32.mrb[9].mxu1 }
 0x104   : > { %v765_v48 = vadd.f32 %v764_v46, %v3985_v60  ;;  %3286 = vmatpush3.bf16.msra.mxu1 %v3603_v25  ;;  %v906_v56 = vmax.f32 %v761_v42, 0.0  ;;  %v881_v26 = vadd.f32 %v880_v22, %v3985_v60  ;;  %v882_v27 = vpop.f32.mrb[10].mxu1 }
 0x105   : > { %v907_v52 = vmax.f32 %v763_v45, 0.0  ;;  %3287 = vmatprep.subr.bf16.mxu1 %v3604_v41  ;;  %v953_v29 = vmax.f32 %v879_v21, 0.0  ;;  %v883_v30 = vadd.f32 %v882_v27, %v3983_v59  ;;  %v884_v31 = vpop.f32.mrb[11].mxu1 }
 0x106   : > { %v908_v57 = vmax.f32 %v765_v48, 0.0  ;;  %v954_v34 = vmax.f32 %v881_v26, 0.0  ;;  %v885_v35 = vadd.f32 %v884_v31, %v3985_v60 }
 0x107   : > { %v965_v62 = vpack.c.bf16 %v907_v52, %v905_v51  ;;  %v955_v38 = vmax.f32 %v883_v30, 0.0 }
 0x108   : > { %v966_v2 = vpack.c.bf16 %v908_v57, %v906_v56  ;;  %v768_v3 = vpop.f32.mrb[12].mxu0  ;;  %3288 = vmatpush3.bf16.msra.mxu1 %v3604_v41  ;;  %v956_v42 = vmax.f32 %v885_v35, 0.0 }
 0x109   : > { %v769_v6 = vadd.f32 %v768_v3, %v3983_v59  ;;  %v770_v7 = vpop.f32.mrb[13].mxu0  ;;  %3289 = vmatprep.subr.bf16.mxu1 %v3605_v55  ;;  %v4047_v45 = vpack.c.bf16 %v955_v38, %v953_v29 }
 0x10a   : > { %v771_v10 = vadd.f32 %v770_v7, %v3985_v60  ;;  %v772_v11 = vpop.f32.mrb[14].mxu0  ;;  %1176 = vmatprep.mubr.bf16.mxu1 %v966_v2  ;;  %v4050_v48 = vpack.c.bf16 %v956_v42, %v954_v34  ;;  %v888_v50 = vpop.f32.mrb[12].mxu1 }
 0x10b   : > { %v773_v13 = vadd.f32 %v772_v11, %v3983_v59  ;;  %v774_v14 = vpop.f32.mrb[15].mxu0  ;;  %1177 = vmatmul.mubr.bf16.gmra.mrb[24].mxu1 %v965_v62  ;;  %v909_v19 = vmax.f32 %v769_v6, 0.0  ;;  %v889_v53 = vadd.f32 %v888_v50, %v3983_v59  ;;  %v890_v54 = vpop.f32.mrb[13].mxu1 }
 0x10c   : > { %v775_v16 = vadd.f32 %v774_v14, %v3985_v60  ;;  %3290 = vmatpush3.bf16.msra.mxu1 %v3605_v55  ;;  %v910_v24 = vmax.f32 %v771_v10, 0.0  ;;  %v891_v57 = vadd.f32 %v890_v54, %v3985_v60  ;;  %v892_v58 = vpop.f32.mrb[14].mxu1  ;;  %v4064_v14 = vld [vmem:[%s4478_s8] sm:$0xff]  }
 0x10d   : > { %v911_v20 = vmax.f32 %v773_v13, 0.0  ;;  %3291 = vmatprep.subr.bf16.mxu1 %v3606_v9  ;;  %v957_v62 = vmax.f32 %v889_v53, 0.0  ;;  %v893_v63 = vadd.f32 %v892_v58, %v3983_v59  ;;  %v894_v0 = vpop.f32.mrb[15].mxu1 }
 0x10e   : > { %v912_v25 = vmax.f32 %v775_v16, 0.0  ;;  %v958_v3 = vmax.f32 %v891_v57, 0.0  ;;  %v895_v4 = vadd.f32 %v894_v0, %v3985_v60 }
 0x10f   : > { %v967_v28 = vpack.c.bf16 %v911_v20, %v909_v19  ;;  %v959_v7 = vmax.f32 %v893_v63, 0.0 }
 0x110   : > { %v968_v32 = vpack.c.bf16 %v912_v25, %v910_v24  ;;  %v778_v33 = vpop.f32.mrb[16].mxu0  ;;  %3292 = vmatpush3.bf16.msra.mxu1 %v3606_v9  ;;  %v960_v10 = vmax.f32 %v895_v4, 0.0 }
 0x111   : > { %v779_v36 = vadd.f32 %v778_v33, %v3983_v59  ;;  %v780_v37 = vpop.f32.mrb[17].mxu0  ;;  %3293 = vmatprep.subr.bf16.mxu1 %v3607_v23  ;;  %v4059_v13 = vpack.c.bf16 %v959_v7, %v957_v62 }
 0x112   : > { %v781_v40 = vadd.f32 %v780_v37, %v3985_v60  ;;  %v782_v41 = vpop.f32.mrb[18].mxu0  ;;  %1184 = vmatprep.mubr.bf16.mxu1 %v968_v32  ;;  %v4067_v18 = vpack.c.bf16 %v960_v10, %v958_v3 }
 0x113   : > { %v783_v43 = vadd.f32 %v782_v41, %v3983_v59  ;;  %v784_v44 = vpop.f32.mrb[19].mxu0  ;;  %1185 = vmatmul.mubr.bf16.gmra.mrb[28].mxu1 %v967_v28  ;;  %v913_v51 = vmax.f32 %v779_v36, 0.0 }
 0x114   : > { %v785_v46 = vadd.f32 %v784_v44, %v3985_v60  ;;  %3294 = vmatpush3.bf16.msra.mxu1 %v3607_v23  ;;  %v914_v55 = vmax.f32 %v781_v40, 0.0 }
 0x115   : > { %v915_v52 = vmax.f32 %v783_v43, 0.0  ;;  %3295 = vmatprep.subr.bf16.mxu1 %v3608_v39 }
 0x116   : > { %v916_v56 = vmax.f32 %v785_v46, 0.0 }
 0x117   : > { %v969_v61 = vpack.c.bf16 %v915_v52, %v913_v51 }
 0x118   : > { %v970_v1 = vpack.c.bf16 %v916_v56, %v914_v55  ;;  %v788_v2 = vpop.f32.mrb[20].mxu0  ;;  %3296 = vmatpush3.bf16.msra.mxu1 %v3608_v39 }
 0x119   : > { %v789_v5 = vadd.f32 %v788_v2, %v3983_v59  ;;  %v790_v6 = vpop.f32.mrb[21].mxu0  ;;  %3329 = vmatprep.subr.bf16.mxu1 %v4064_v14 }
 0x11a   : > { %v791_v8 = vadd.f32 %v790_v6, %v3985_v60  ;;  %v792_v9 = vpop.f32.mrb[22].mxu0  ;;  %1192 = vmatprep.mubr.bf16.mxu1 %v970_v1 }
 0x11b   : > { %v793_v11 = vadd.f32 %v792_v9, %v3983_v59  ;;  %v794_v12 = vpop.f32.mrb[23].mxu0  ;;  %1193 = vmatmul.mubr.bf16.gmra.mrb[32].mxu1 %v969_v61  ;;  %v917_v19 = vmax.f32 %v789_v5, 0.0 }
 0x11c   : > { %v795_v16 = vadd.f32 %v794_v12, %v3985_v60  ;;  %v918_v21 = vmax.f32 %v791_v8, 0.0 }
 0x11d   : > { %v919_v20 = vmax.f32 %v793_v11, 0.0 }
 0x11e   : > { %v920_v22 = vmax.f32 %v795_v16, 0.0 }
 0x11f   : > { %v971_v23 = vpack.c.bf16 %v919_v20, %v917_v19 }
 0x120   : > { %v972_v24 = vpack.c.bf16 %v920_v22, %v918_v21  ;;  %v798_v25 = vpop.f32.mrb[24].mxu0 }
 0x121   : > { %v799_v26 = vadd.f32 %v798_v25, %v3983_v59  ;;  %v800_v27 = vpop.f32.mrb[25].mxu0 }
 0x122   : > { %v801_v28 = vadd.f32 %v800_v27, %v3985_v60  ;;  %v802_v29 = vpop.f32.mrb[26].mxu0  ;;  %1200 = vmatprep.mubr.bf16.mxu1 %v972_v24 }
 0x123   : > { %v803_v30 = vadd.f32 %v802_v29, %v3983_v59  ;;  %v804_v31 = vpop.f32.mrb[27].mxu0  ;;  %1201 = vmatmul.mubr.bf16.gmra.mrb[36].mxu1 %v971_v23  ;;  %v921_v33 = vmax.f32 %v799_v26, 0.0 }
 0x124   : > { %v805_v32 = vadd.f32 %v804_v31, %v3985_v60  ;;  %v922_v35 = vmax.f32 %v801_v28, 0.0 }
 0x125   : > { %v923_v34 = vmax.f32 %v803_v30, 0.0 }
 0x126   : > { %v924_v36 = vmax.f32 %v805_v32, 0.0 }
 0x127   : > { %v973_v37 = vpack.c.bf16 %v923_v34, %v921_v33 }
 0x128   : > { %v974_v38 = vpack.c.bf16 %v924_v36, %v922_v35  ;;  %v808_v39 = vpop.f32.mrb[28].mxu0 }
 0x129   : > { %v809_v40 = vadd.f32 %v808_v39, %v3983_v59  ;;  %v810_v41 = vpop.f32.mrb[29].mxu0 }
 0x12a   : > { %v811_v42 = vadd.f32 %v810_v41, %v3985_v60  ;;  %v812_v43 = vpop.f32.mrb[30].mxu0  ;;  %1208 = vmatprep.mubr.bf16.mxu1 %v974_v38 }
 0x12b   : > { %v813_v44 = vadd.f32 %v812_v43, %v3983_v59  ;;  %v814_v46 = vpop.f32.mrb[31].mxu0  ;;  %1209 = vmatmul.mubr.bf16.gmra.mrb[40].mxu1 %v973_v37  ;;  %v925_v51 = vmax.f32 %v809_v40, 0.0 }
 0x12c   : > { %v815_v50 = vadd.f32 %v814_v46, %v3985_v60  ;;  %v926_v53 = vmax.f32 %v811_v42, 0.0 }
 0x12d   : > { %v927_v52 = vmax.f32 %v813_v44, 0.0 }
 0x12e   : > { %v928_v54 = vmax.f32 %v815_v50, 0.0 }
 0x12f   : > { %v975_v55 = vpack.c.bf16 %v927_v52, %v925_v51 }
 0x130   : > { %v976_v56 = vpack.c.bf16 %v928_v54, %v926_v53  ;;  %v818_v57 = vpop.f32.mrb[32].mxu0 }
 0x131   : > { %v819_v58 = vadd.f32 %v818_v57, %v3983_v59  ;;  %v820_v61 = vpop.f32.mrb[33].mxu0 }
 0x132   : > { %v821_v62 = vadd.f32 %v820_v61, %v3985_v60  ;;  %v822_v63 = vpop.f32.mrb[34].mxu0  ;;  %1216 = vmatprep.mubr.bf16.mxu1 %v976_v56 }
 0x133   : > { %v823_v0 = vadd.f32 %v822_v63, %v3983_v59  ;;  %v824_v1 = vpop.f32.mrb[35].mxu0  ;;  %1217 = vmatmul.mubr.bf16.gmra.mrb[44].mxu1 %v975_v55  ;;  %v929_v3 = vmax.f32 %v819_v58, 0.0  ;;  %v4097_v58 = vld [vmem:[%s4477_s7] ss:$0 sm:$0xff] }
 0x134   : > { %v825_v2 = vadd.f32 %v824_v1, %v3985_v60  ;;  %v930_v5 = vmax.f32 %v821_v62, 0.0 }
 0x135   : > { %v931_v4 = vmax.f32 %v823_v0, 0.0 }
 0x136   : > { %v932_v6 = vmax.f32 %v825_v2, 0.0 }
 0x137   : > { %v977_v7 = vpack.c.bf16 %v931_v4, %v929_v3 }
 0x138   : > { %v978_v8 = vpack.c.bf16 %v932_v6, %v930_v5  ;;  %v828_v9 = vpop.f32.mrb[36].mxu0 }
 0x139   : > { %v829_v10 = vadd.f32 %v828_v9, %v3983_v59  ;;  %v830_v11 = vpop.f32.mrb[37].mxu0 }
 0x13a   : > { %v831_v12 = vadd.f32 %v830_v11, %v3985_v60  ;;  %v832_v16 = vpop.f32.mrb[38].mxu0  ;;  %1224 = vmatprep.mubr.bf16.mxu1 %v978_v8 }
 0x13b   : > { %v833_v19 = vadd.f32 %v832_v16, %v3983_v59  ;;  %v834_v20 = vpop.f32.mrb[39].mxu0  ;;  %1225 = vmatmul.mubr.bf16.gmra.mrb[48].mxu1 %v977_v7  ;;  %v933_v22 = vmax.f32 %v829_v10, 0.0 }
 0x13c   : > { %v835_v21 = vadd.f32 %v834_v20, %v3985_v60  ;;  %v934_v24 = vmax.f32 %v831_v12, 0.0 }
 0x13d   : > { %v935_v23 = vmax.f32 %v833_v19, 0.0 }
 0x13e   : > { %v936_v25 = vmax.f32 %v835_v21, 0.0 }
 0x13f   : > { %v979_v26 = vpack.c.bf16 %v935_v23, %v933_v22 }
 0x140   : > { %v980_v27 = vpack.c.bf16 %v936_v25, %v934_v24  ;;  %v838_v28 = vpop.f32.mrb[40].mxu0 }
 0x141   : > { %v839_v29 = vadd.f32 %v838_v28, %v3983_v59  ;;  %v840_v30 = vpop.f32.mrb[41].mxu0 }
 0x142   : > { %v841_v31 = vadd.f32 %v840_v30, %v3985_v60  ;;  %v842_v32 = vpop.f32.mrb[42].mxu0  ;;  %1232 = vmatprep.mubr.bf16.mxu1 %v980_v27 }
 0x143   : > { %v843_v33 = vadd.f32 %v842_v32, %v3983_v59  ;;  %v844_v34 = vpop.f32.mrb[43].mxu0  ;;  %1233 = vmatmul.mubr.bf16.gmra.mrb[52].mxu1 %v979_v26  ;;  %v937_v36 = vmax.f32 %v839_v29, 0.0 }
 0x144   : > { %v845_v35 = vadd.f32 %v844_v34, %v3985_v60  ;;  %v938_v38 = vmax.f32 %v841_v31, 0.0 }
 0x145   : > { %v939_v37 = vmax.f32 %v843_v33, 0.0 }
 0x146   : > { %v940_v39 = vmax.f32 %v845_v35, 0.0 }
 0x147   : > { %v981_v40 = vpack.c.bf16 %v939_v37, %v937_v36 }
 0x148   : > { %v982_v41 = vpack.c.bf16 %v940_v39, %v938_v38  ;;  %v848_v42 = vpop.f32.mrb[44].mxu0 }
 0x149   : > { %v849_v43 = vadd.f32 %v848_v42, %v3983_v59  ;;  %v850_v44 = vpop.f32.mrb[45].mxu0 }
 0x14a   : > { %v851_v46 = vadd.f32 %v850_v44, %v3985_v60  ;;  %v852_v50 = vpop.f32.mrb[46].mxu0  ;;  %1240 = vmatprep.mubr.bf16.mxu1 %v982_v41 }
 0x14b   : > { %v853_v51 = vadd.f32 %v852_v50, %v3983_v59  ;;  %v854_v52 = vpop.f32.mrb[47].mxu0  ;;  %1241 = vmatmul.mubr.bf16.gmra.mrb[56].mxu1 %v981_v40  ;;  %v941_v54 = vmax.f32 %v849_v43, 0.0 }
 0x14c   : > { %v855_v53 = vadd.f32 %v854_v52, %v3985_v60  ;;  %v942_v56 = vmax.f32 %v851_v46, 0.0 }
 0x14d   : > { %v943_v55 = vmax.f32 %v853_v51, 0.0 }
 0x14e   : > { %v944_v57 = vmax.f32 %v855_v53, 0.0 }
 0x14f   : > { %v983_v61 = vpack.c.bf16 %v943_v55, %v941_v54 }
 0x150   : > { %v984_v62 = vpack.c.bf16 %v944_v57, %v942_v56  ;;  %v3251_v63 = vpop.f32.mrb[48].mxu0 }
 0x151   : > { %v1553_v0 = vadd.f32 %v3251_v63, %v4097_v58  ;;  %v1544_v1 = vpop.f32.mrb[49].mxu0 }
 0x152   : > { %1248 = vmatprep.mubr.bf16.mxu1 %v984_v62  ;;  %v1545_v59 = vadd.f32 %v4097_v58, %v1544_v1  ;;  %v3252_v2 = vpop.f32.mrb[50].mxu0 }
 0x153   : > { %1249 = vmatmul.mubr.bf16.gmra.mrb[60].mxu1 %v983_v61  ;;  %v1673_v60 = vmax.f32 %v1553_v0, 0.0  ;;  %v1556_v3 = vadd.f32 %v3252_v2, %v4097_v58  ;;  %v1547_v4 = vpop.f32.mrb[51].mxu0 }
 0x154   : > { %1256 = vmatprep.mubr.bf16.mxu1 %v4014_v49  ;;  %v1671_v5 = vmax.f32 %v1545_v59, 0.0  ;;  %v1548_v6 = vadd.f32 %v4097_v58, %v1547_v4 }
 0x155   : > { %v1674_v7 = vmax.f32 %v1556_v3, 0.0 }
 0x156   : > { %v1672_v8 = vmax.f32 %v1548_v6, 0.0 }
 0x157   : > { %v4104_v9 = vpack.c.bf16 %v1674_v7, %v1673_v60 }
 0x158   : > { %v1703_v10 = vpack.c.bf16 %v1672_v8, %v1671_v5  ;;  %v3255_v11 = vpop.f32.mrb[52].mxu0 }
 0x159   : > { %v1569_v12 = vadd.f32 %v3255_v11, %v4097_v58  ;;  %v1560_v16 = vpop.f32.mrb[53].mxu0 }
 0x15a   : > { %v1561_v19 = vadd.f32 %v4097_v58, %v1560_v16  ;;  %v3256_v20 = vpop.f32.mrb[54].mxu0 }
 0x15b   : > { %1257 = vmatmul.mubr.bf16.gmra.mrb[64].mxu1 %v4011_v47  ;;  %v1677_v21 = vmax.f32 %v1569_v12, 0.0  ;;  %v1572_v49 = vadd.f32 %v3256_v20, %v4097_v58  ;;  %v1563_v22 = vpop.f32.mrb[55].mxu0 }
 0x15c   : > { %1264 = vmatprep.mubr.bf16.mxu1 %v4032_v17  ;;  %v1675_v23 = vmax.f32 %v1561_v19, 0.0  ;;  %v1564_v24 = vadd.f32 %v4097_v58, %v1563_v22  ;;  %v3611_v22 = vld [vmem:[%s4478_s8 + $0x10] sm:$0xff]  }
 0x15d   : > { %v1678_v25 = vmax.f32 %v1572_v49, 0.0 }
 0x15e   : > { %v1676_v26 = vmax.f32 %v1564_v24, 0.0 }
 0x15f   : > { %v4112_v27 = vpack.c.bf16 %v1678_v25, %v1677_v21 }
 0x160   : > { %v1705_v28 = vpack.c.bf16 %v1676_v26, %v1675_v23  ;;  %v3259_v29 = vpop.f32.mrb[56].mxu0 }
 0x161   : > { %v1585_v30 = vadd.f32 %v3259_v29, %v4097_v58  ;;  %v1576_v31 = vpop.f32.mrb[57].mxu0 }
 0x162   : > { %v1577_v47 = vadd.f32 %v4097_v58, %v1576_v31  ;;  %v3260_v32 = vpop.f32.mrb[58].mxu0 }
 0x163   : > { %1265 = vmatmul.mubr.bf16.gmra.mrb[68].mxu1 %v4029_v15  ;;  %v1681_v33 = vmax.f32 %v1585_v30, 0.0  ;;  %v1588_v17 = vadd.f32 %v3260_v32, %v4097_v58  ;;  %v1579_v34 = vpop.f32.mrb[59].mxu0 }
 0x164   : > { %1272 = vmatprep.mubr.bf16.mxu1 %v4050_v48  ;;  %v1679_v35 = vmax.f32 %v1577_v47, 0.0  ;;  %v1580_v36 = vadd.f32 %v4097_v58, %v1579_v34 }
 0x165   : > { %v1682_v37 = vmax.f32 %v1588_v17, 0.0 }
 0x166   : > { %v1680_v38 = vmax.f32 %v1580_v36, 0.0 }
 0x167   : > { %v4120_v39 = vpack.c.bf16 %v1682_v37, %v1681_v33 }
 0x168   : > { %v4122_v40 = vpack.c.bf16 %v1680_v38, %v1679_v35  ;;  %v3263_v41 = vpop.f32.mrb[60].mxu0  ;;  %v3613_v35 = vld [vmem:[%s4478_s8 + $0x20] sm:$0xff]  }
 0x169   : > { %v1601_v42 = vadd.f32 %v3263_v41, %v4097_v58  ;;  %v1592_v43 = vpop.f32.mrb[61].mxu0 }
 0x16a   : > { %v1593_v15 = vadd.f32 %v4097_v58, %v1592_v43  ;;  %v3264_v44 = vpop.f32.mrb[62].mxu0 }
 0x16b   : > { %1273 = vmatmul.mubr.bf16.gmra.mrb[72].mxu1 %v4047_v45  ;;  %v1685_v46 = vmax.f32 %v1601_v42, 0.0  ;;  %v1604_v48 = vadd.f32 %v3264_v44, %v4097_v58  ;;  %v1595_v50 = vpop.f32.mrb[63].mxu0 }
 0x16c   : > { %1280 = vmatprep.mubr.bf16.mxu1 %v4067_v18  ;;  %v1683_v51 = vmax.f32 %v1593_v15, 0.0  ;;  %v1596_v52 = vadd.f32 %v4097_v58, %v1595_v50 }
 0x16d   : > { %v1686_v53 = vmax.f32 %v1604_v48, 0.0 }
 0x16e   : > { %v1684_v54 = vmax.f32 %v1596_v52, 0.0 }
 0x16f   : > { %v4130_v55 = vpack.c.bf16 %v1686_v53, %v1685_v46  ;;  %v3615_v53 = vld [vmem:[%s4478_s8 + $0x30] sm:$0xff]  }
 0x170   : > { %v4132_v56 = vpack.c.bf16 %v1684_v54, %v1683_v51  ;;  %v3267_v57 = vpop.f32.mrb[64].mxu0 }
 0x171   : > { %v1617_v61 = vadd.f32 %v3267_v57, %v4097_v58  ;;  %v1608_v62 = vpop.f32.mrb[65].mxu0 }
 0x172   : > { %v1609_v45 = vadd.f32 %v4097_v58, %v1608_v62  ;;  %v3268_v63 = vpop.f32.mrb[66].mxu0 }
 0x173   : > { %1281 = vmatmul.mubr.bf16.gmra.mrb[76].mxu1 %v4059_v13  ;;  %v1689_v0 = vmax.f32 %v1617_v61, 0.0  ;;  %v1620_v18 = vadd.f32 %v3268_v63, %v4097_v58  ;;  %v1611_v1 = vpop.f32.mrb[67].mxu0  ;;  %v3610_v13 = vld [vmem:[%s4478_s8 + $0x8] sm:$0xff]  }
 0x174   : > { %3297 = vmatprep.mubr.bf16.mxu1 %v1703_v10  ;;  %v1687_v59 = vmax.f32 %v1609_v45, 0.0  ;;  %v1612_v2 = vadd.f32 %v4097_v58, %v1611_v1  ;;  %v3617_v1 = vld [vmem:[%s4481_s11] sm:$0xff]  }
 0x175   : > { %v1690_v60 = vmax.f32 %v1620_v18, 0.0  ;;  %3377 = vmatprep.subr.bf16.mxu0 %v3617_v1 }
 0x176   : > { %v1688_v3 = vmax.f32 %v1612_v2, 0.0  ;;  %3378 = vmatpush3.bf16.msra.mxu0 %v3617_v1 }
 0x177   : > { %v4139_v4 = vpack.c.bf16 %v1690_v60, %v1689_v0 }
 0x178   : > { %v4141_v5 = vpack.c.bf16 %v1688_v3, %v1687_v59  ;;  %v3271_v6 = vpop.f32.mrb[68].mxu0  ;;  %v3618_v59 = vld [vmem:[%s4481_s11 + $0x8] sm:$0xff]  }
 0x179   : > { %v1633_v7 = vadd.f32 %v3271_v6, %v4097_v58  ;;  %v1624_v8 = vpop.f32.mrb[69].mxu0  ;;  %3379 = vmatprep.subr.bf16.mxu0 %v3618_v59 }
 0x17a   : > { %v1625_v11 = vadd.f32 %v4097_v58, %v1624_v8  ;;  %v3272_v10 = vpop.f32.mrb[70].mxu0  ;;  %3380 = vmatpush3.bf16.msra.mxu0 %v3618_v59 }
 0x17b   : > { %3298 = vmatmul.mubr.bf16.vlgmr.msra.gmra.mrb[80].mxu1 %v4104_v9  ;;  %v1693_v12 = vmax.f32 %v1633_v7, 0.0  ;;  %v1636_v16 = vadd.f32 %v3272_v10, %v4097_v58  ;;  %v1627_v19 = vpop.f32.mrb[71].mxu0 }
 0x17c   : > { %3301 = vmatprep.mubr.bf16.mxu1 %v1705_v28  ;;  %v1691_v20 = vmax.f32 %v1625_v11, 0.0  ;;  %v1628_v21 = vadd.f32 %v4097_v58, %v1627_v19  ;;  %3330 = vmatpush3.bf16.msra.mxu1 %v4064_v14  ;;  %v3612_v28 = vld [vmem:[%s4478_s8 + $0x18] sm:$0xff]  }
 0x17d   : > { %v1694_v49 = vmax.f32 %v1636_v16, 0.0  ;;  %3331 = vmatprep.subr.bf16.mxu1 %v3610_v13  ;;  %v3620_v16 = vld [vmem:[%s4481_s11 + $0x18] sm:$0xff]  }
 0x17e   : > { %v1692_v23 = vmax.f32 %v1628_v21, 0.0 }
 0x17f   : > { %v1714_v24 = vpack.c.bf16 %v1694_v49, %v1693_v12 }
 0x180   : > { %v1713_v25 = vpack.c.bf16 %v1692_v23, %v1691_v20  ;;  %v3275_v9 = vpop.f32.mrb[72].mxu0  ;;  %3332 = vmatpush3.bf16.msra.mxu1 %v3610_v13 }
 0x181   : > { %v1649_v26 = vadd.f32 %v3275_v9, %v4097_v58  ;;  %v1640_v29 = vpop.f32.mrb[73].mxu0  ;;  %3333 = vmatprep.subr.bf16.mxu1 %v3611_v22 }
 0x182   : > { %v1641_v14 = vadd.f32 %v4097_v58, %v1640_v29  ;;  %v3276_v30 = vpop.f32.mrb[74].mxu0 }
 0x183   : > { %3302 = vmatmul.mubr.bf16.gmra.mrb[84].mxu1 %v4112_v27  ;;  %v1697_v31 = vmax.f32 %v1649_v26, 0.0  ;;  %v1652_v47 = vadd.f32 %v3276_v30, %v4097_v58  ;;  %v1643_v32 = vpop.f32.mrb[75].mxu0 }
 0x184   : > { %3305 = vmatprep.mubr.bf16.mxu1 %v4122_v40  ;;  %v1695_v33 = vmax.f32 %v1641_v14, 0.0  ;;  %v1644_v17 = vadd.f32 %v4097_v58, %v1643_v32  ;;  %3334 = vmatpush3.bf16.msra.mxu1 %v3611_v22  ;;  %v3614_v40 = vld [vmem:[%s4478_s8 + $0x28] sm:$0xff]   ;;  %v3621_v22 = vld [vmem:[%s4481_s11 + $0x20] sm:$0xff]  }
 0x185   : > { %v1698_v34 = vmax.f32 %v1652_v47, 0.0  ;;  %3335 = vmatprep.subr.bf16.mxu1 %v3612_v28  ;;  %v3622_v14 = vld [vmem:[%s4481_s11 + $0x28] sm:$0xff]  }
 0x186   : > { %v1696_v36 = vmax.f32 %v1644_v17, 0.0 }
 0x187   : > { %v1716_v37 = vpack.c.bf16 %v1698_v34, %v1697_v31 }
 0x188   : > { %v1715_v38 = vpack.c.bf16 %v1696_v36, %v1695_v33  ;;  %v3279_v27 = vpop.f32.mrb[76].mxu0  ;;  %3336 = vmatpush3.bf16.msra.mxu1 %v3612_v28 }
 0x189   : > { %v1665_v41 = vadd.f32 %v3279_v27, %v4097_v58  ;;  %v1656_v42 = vpop.f32.mrb[77].mxu0  ;;  %3337 = vmatprep.subr.bf16.mxu1 %v3613_v35 }
 0x18a   : > { %v1657_v43 = vadd.f32 %v4097_v58, %v1656_v42  ;;  %v3280_v15 = vpop.f32.mrb[78].mxu0 }
 0x18b   : > { %3306 = vmatmul.mubr.bf16.gmra.mrb[88].mxu1 %v4120_v39  ;;  %v1701_v44 = vmax.f32 %v1665_v41, 0.0  ;;  %v1668_v46 = vadd.f32 %v3280_v15, %v4097_v58  ;;  %v1659_v48 = vpop.f32.mrb[79].mxu0  ;;  %v3616_v39 = vld [vmem:[%s4478_s8 + $0x38] sm:$0xff]  }
 0x18c   : > { %3309 = vmatprep.mubr.bf16.mxu1 %v4132_v56  ;;  %v1699_v50 = vmax.f32 %v1657_v43, 0.0  ;;  %v1660_v51 = vadd.f32 %v4097_v58, %v1659_v48  ;;  %3338 = vmatpush3.bf16.msra.mxu1 %v3613_v35  ;;  %v4188_v56 = vld [vmem:[%s4475_s5] ss:$0 sm:$0xff] }
 0x18d   : > { %v1702_v52 = vmax.f32 %v1668_v46, 0.0  ;;  %3339 = vmatprep.subr.bf16.mxu1 %v3614_v40 }
 0x18e   : > { %v1700_v54 = vmax.f32 %v1660_v51, 0.0 }
 0x18f   : > { %v1718_v57 = vpack.c.bf16 %v1702_v52, %v1701_v44 }
 0x190   : > { %v1717_v61 = vpack.c.bf16 %v1700_v54, %v1699_v50  ;;  %3340 = vmatpush3.bf16.msra.mxu1 %v3614_v40 }
 0x191   : > { %3341 = vmatprep.subr.bf16.mxu1 %v3615_v53 }
 0x193   : > { %3310 = vmatmul.mubr.bf16.gmra.mrb[92].mxu1 %v4130_v55 }
 0x194   : > { %3313 = vmatprep.mubr.bf16.mxu1 %v4141_v5  ;;  %3342 = vmatpush3.bf16.msra.mxu1 %v3615_v53  ;;  %v3619_v5 = vld [vmem:[%s4481_s11 + $0x10] sm:$0xff]  }
 0x195   : > { %3343 = vmatprep.subr.bf16.mxu1 %v3616_v39  ;;  %3381 = vmatprep.subr.bf16.mxu0 %v3619_v5 }
 0x196   : > { %3382 = vmatpush3.bf16.msra.mxu0 %v3619_v5 }
 0x197   : > { %3383 = vmatprep.subr.bf16.mxu0 %v3620_v16 }
 0x198   : > { %3344 = vmatpush3.bf16.msra.mxu1 %v3616_v39 }
 0x19a   : > { %3384 = vmatpush3.bf16.msra.mxu0 %v3620_v16 }
 0x19b   : > { %3314 = vmatmul.mubr.bf16.gmra.mrb[96].mxu1 %v4139_v4  ;;  %3385 = vmatprep.subr.bf16.mxu0 %v3621_v22 }
 0x19c   : > { %3317 = vmatprep.mubr.bf16.mxu1 %v1713_v25 }
 0x19e   : > { %3386 = vmatpush3.bf16.msra.mxu0 %v3621_v22 }
 0x19f   : > { %3387 = vmatprep.subr.bf16.mxu0 %v3622_v14 }
 0x1a2   : > { %3388 = vmatpush3.bf16.msra.mxu0 %v3622_v14 }
 0x1a3   : > { %3318 = vmatmul.mubr.bf16.gmra.mrb[100].mxu1 %v1714_v24 }
 0x1a4   : > { %3321 = vmatprep.mubr.bf16.mxu1 %v1715_v38 }
 0x1ab   : > { %3322 = vmatmul.mubr.bf16.gmra.mrb[104].mxu1 %v1716_v37 }
 0x1ac   : > { %3325 = vmatprep.mubr.bf16.mxu1 %v1717_v61 }
 0x1b3   : > { %3326 = vmatmul.mubr.bf16.gmra.mrb[108].mxu1 %v1718_v57 }
 0x1ce   : > { %v3038_v58 = vpop.f32.mrb[16].mxu1 }
 0x1cf   : > { %v3039_v55 = vpop.f32.mrb[17].mxu1 }
 0x1d0   : > { %v3040_v62 = vadd.f32 %v3039_v55, %v3038_v58  ;;  %v3041_v45 = vpop.f32.mrb[18].mxu1 }
 0x1d1   : > { %v3042_v63 = vpop.f32.mrb[19].mxu1 }
 0x1d2   : > { %v1163_v0 = vadd.f32 %v3040_v62, %v4188_v56  ;;  %v3043_v18 = vadd.f32 %v3042_v63, %v3041_v45 }
 0x1d4   : > { %v1166_v2 = vadd.f32 %v3043_v18, %v4188_v56  ;;  %v1289_v60 = vmax.f32 %v1163_v0, 0.0 }
 0x1d6   : > { %v1290_v3 = vmax.f32 %v1166_v2, 0.0  ;;  %v3044_v4 = vpop.f32.mrb[20].mxu1 }
 0x1d7   : > { %v3045_v6 = vpop.f32.mrb[21].mxu1 }
 0x1d8   : > { %v3046_v7 = vadd.f32 %v3045_v6, %v3044_v4  ;;  %v3047_v8 = vpop.f32.mrb[22].mxu1  ;;  %v1321_v13 = vpack.c.bf16 %v1290_v3, %v1289_v60 }
 0x1d9   : > { %v3048_v11 = vpop.f32.mrb[23].mxu1 }
 0x1da   : > { %v1171_v10 = vadd.f32 %v3046_v7, %v4188_v56  ;;  %v3049_v12 = vadd.f32 %v3048_v11, %v3047_v8  ;;  %3345 = vmatprep.mubr.bf16.mxu1 %v1321_v13 }
 0x1dc   : > { %v1174_v19 = vadd.f32 %v3049_v12, %v4188_v56  ;;  %v1291_v20 = vmax.f32 %v1171_v10, 0.0 }
 0x1de   : > { %v1292_v21 = vmax.f32 %v1174_v19, 0.0  ;;  %v3050_v49 = vpop.f32.mrb[24].mxu1 }
 0x1df   : > { %v3051_v23 = vpop.f32.mrb[25].mxu1 }
 0x1e0   : > { %v1322_v24 = vpack.c.bf16 %v1292_v21, %v1291_v20  ;;  %v3052_v25 = vadd.f32 %v3051_v23, %v3050_v49  ;;  %v3053_v9 = vpop.f32.mrb[26].mxu1 }
 0x1e1   : > { %v3054_v26 = vpop.f32.mrb[27].mxu1 }
 0x1e2   : > { %v1179_v29 = vadd.f32 %v3052_v25, %v4188_v56  ;;  %v3055_v28 = vadd.f32 %v3054_v26, %v3053_v9  ;;  %3346 = vmatmul.mubr.bf16.vlgmr.msra.gmra.mrb[80].mxu1 %v1322_v24 }
 0x1e4   : > { %v1182_v30 = vadd.f32 %v3055_v28, %v4188_v56  ;;  %v1293_v31 = vmax.f32 %v1179_v29, 0.0 }
 0x1e6   : > { %v1294_v47 = vmax.f32 %v1182_v30, 0.0  ;;  %v3056_v32 = vpop.f32.mrb[28].mxu1 }
 0x1e7   : > { %v3057_v33 = vpop.f32.mrb[29].mxu1 }
 0x1e8   : > { %v3058_v17 = vadd.f32 %v3057_v33, %v3056_v32  ;;  %v3059_v34 = vpop.f32.mrb[30].mxu1  ;;  %v1323_v35 = vpack.c.bf16 %v1294_v47, %v1293_v31 }
 0x1e9   : > { %v3060_v36 = vpop.f32.mrb[31].mxu1 }
 0x1ea   : > { %v1187_v37 = vadd.f32 %v3058_v17, %v4188_v56  ;;  %v3061_v38 = vadd.f32 %v3060_v36, %v3059_v34  ;;  %3349 = vmatprep.mubr.bf16.mxu1 %v1323_v35 }
 0x1ec   : > { %v1190_v27 = vadd.f32 %v3061_v38, %v4188_v56  ;;  %v1295_v41 = vmax.f32 %v1187_v37, 0.0 }
 0x1ee   : > { %v1296_v42 = vmax.f32 %v1190_v27, 0.0  ;;  %v3062_v40 = vpop.f32.mrb[32].mxu1 }
 0x1ef   : > { %v3063_v43 = vpop.f32.mrb[33].mxu1 }
 0x1f0   : > { %v3064_v15 = vadd.f32 %v3063_v43, %v3062_v40  ;;  %v3065_v44 = vpop.f32.mrb[34].mxu1  ;;  %v1324_v46 = vpack.c.bf16 %v1296_v42, %v1295_v41 }
 0x1f1   : > { %v3066_v48 = vpop.f32.mrb[35].mxu1 }
 0x1f2   : > { %v1195_v50 = vadd.f32 %v3064_v15, %v4188_v56  ;;  %v3067_v51 = vadd.f32 %v3066_v48, %v3065_v44  ;;  %3350 = vmatmul.mubr.bf16.gmra.mrb[84].mxu1 %v1324_v46 }
 0x1f4   : > { %v1198_v52 = vadd.f32 %v3067_v51, %v4188_v56  ;;  %v1297_v53 = vmax.f32 %v1195_v50, 0.0 }
 0x1f6   : > { %v1298_v54 = vmax.f32 %v1198_v52, 0.0  ;;  %v3068_v57 = vpop.f32.mrb[36].mxu1 }
 0x1f7   : > { %v3069_v61 = vpop.f32.mrb[37].mxu1 }
 0x1f8   : > { %v3070_v39 = vadd.f32 %v3069_v61, %v3068_v57  ;;  %v3071_v58 = vpop.f32.mrb[38].mxu1  ;;  %v1325_v55 = vpack.c.bf16 %v1298_v54, %v1297_v53 }
 0x1f9   : > { %v3072_v62 = vpop.f32.mrb[39].mxu1 }
 0x1fa   : > { %v1203_v45 = vadd.f32 %v3070_v39, %v4188_v56  ;;  %v3073_v63 = vadd.f32 %v3072_v62, %v3071_v58  ;;  %3353 = vmatprep.mubr.bf16.mxu1 %v1325_v55 }
 0x1fc   : > { %v1206_v0 = vadd.f32 %v3073_v63, %v4188_v56  ;;  %v1299_v18 = vmax.f32 %v1203_v45, 0.0 }
 0x1fe   : > { %v1300_v1 = vmax.f32 %v1206_v0, 0.0  ;;  %v3074_v59 = vpop.f32.mrb[40].mxu1 }
 0x1ff   : > { %v3075_v2 = vpop.f32.mrb[41].mxu1 }
 0x200   : > { %v3076_v60 = vadd.f32 %v3075_v2, %v3074_v59  ;;  %v3077_v3 = vpop.f32.mrb[42].mxu1  ;;  %v1326_v4 = vpack.c.bf16 %v1300_v1, %v1299_v18 }
 0x201   : > { %v3078_v5 = vpop.f32.mrb[43].mxu1 }
 0x202   : > { %v1211_v6 = vadd.f32 %v3076_v60, %v4188_v56  ;;  %v3079_v7 = vadd.f32 %v3078_v5, %v3077_v3  ;;  %3354 = vmatmul.mubr.bf16.gmra.mrb[88].mxu1 %v1326_v4 }
 0x204   : > { %v1214_v8 = vadd.f32 %v3079_v7, %v4188_v56  ;;  %v1301_v13 = vmax.f32 %v1211_v6, 0.0 }
 0x206   : > { %v1302_v11 = vmax.f32 %v1214_v8, 0.0  ;;  %v3080_v10 = vpop.f32.mrb[44].mxu1 }
 0x207   : > { %v3081_v12 = vpop.f32.mrb[45].mxu1 }
 0x208   : > { %v3082_v16 = vadd.f32 %v3081_v12, %v3080_v10  ;;  %v3083_v19 = vpop.f32.mrb[46].mxu1  ;;  %v1327_v20 = vpack.c.bf16 %v1302_v11, %v1301_v13 }
 0x209   : > { %v3084_v21 = vpop.f32.mrb[47].mxu1 }
 0x20a   : > { %v1219_v49 = vadd.f32 %v3082_v16, %v4188_v56  ;;  %v3085_v22 = vadd.f32 %v3084_v21, %v3083_v19  ;;  %3357 = vmatprep.mubr.bf16.mxu1 %v1327_v20  ;;  %v3623_v20 = vld [vmem:[%s4481_s11 + $0x30] sm:$0xff]  }
 0x20b   : > { %3389 = vmatprep.subr.bf16.mxu0 %v3623_v20 }
 0x20c   : > { %v1222_v23 = vadd.f32 %v3085_v22, %v4188_v56  ;;  %v1303_v24 = vmax.f32 %v1219_v49, 0.0  ;;  %3390 = vmatpush3.bf16.msra.mxu0 %v3623_v20  ;;  %v3629_v20 = vld [vmem:[%s4483_s13 + $0x20] sm:$0xff]  }
 0x20e   : > { %v1304_v25 = vmax.f32 %v1222_v23, 0.0  ;;  %v3086_v9 = vpop.f32.mrb[48].mxu1 }
 0x20f   : > { %v3087_v26 = vpop.f32.mrb[49].mxu1 }
 0x210   : > { %v3088_v29 = vadd.f32 %v3087_v26, %v3086_v9  ;;  %v3089_v28 = vpop.f32.mrb[50].mxu1  ;;  %v1328_v14 = vpack.c.bf16 %v1304_v25, %v1303_v24  ;;  %v3624_v26 = vld [vmem:[%s4481_s11 + $0x38] sm:$0xff]  }
 0x211   : > { %v3090_v30 = vpop.f32.mrb[51].mxu1  ;;  %3391 = vmatprep.subr.bf16.mxu0 %v3624_v26 }
 0x212   : > { %v1227_v31 = vadd.f32 %v3088_v29, %v4188_v56  ;;  %v3091_v47 = vadd.f32 %v3090_v30, %v3089_v28  ;;  %3358 = vmatmul.mubr.bf16.gmra.mrb[92].mxu1 %v1328_v14  ;;  %3392 = vmatpush3.bf16.msra.mxu0 %v3624_v26 }
 0x214   : > { %v1230_v32 = vadd.f32 %v3091_v47, %v4188_v56  ;;  %v1305_v33 = vmax.f32 %v1227_v31, 0.0 }
 0x216   : > { %v1306_v17 = vmax.f32 %v1230_v32, 0.0  ;;  %v3092_v34 = vpop.f32.mrb[52].mxu1 }
 0x217   : > { %v3093_v35 = vpop.f32.mrb[53].mxu1 }
 0x218   : > { %v3094_v36 = vadd.f32 %v3093_v35, %v3092_v34  ;;  %v3095_v37 = vpop.f32.mrb[54].mxu1  ;;  %v1329_v38 = vpack.c.bf16 %v1306_v17, %v1305_v33 }
 0x219   : > { %v3096_v27 = vpop.f32.mrb[55].mxu1 }
 0x21a   : > { %v1235_v41 = vadd.f32 %v3094_v36, %v4188_v56  ;;  %v3097_v42 = vadd.f32 %v3096_v27, %v3095_v37  ;;  %3361 = vmatprep.mubr.bf16.mxu1 %v1329_v38 }
 0x21c   : > { %v1238_v40 = vadd.f32 %v3097_v42, %v4188_v56  ;;  %v1307_v43 = vmax.f32 %v1235_v41, 0.0 }
 0x21e   : > { %v1308_v15 = vmax.f32 %v1238_v40, 0.0  ;;  %v3098_v44 = vpop.f32.mrb[56].mxu1 }
 0x21f   : > { %v3099_v46 = vpop.f32.mrb[57].mxu1 }
 0x220   : > { %v3100_v48 = vadd.f32 %v3099_v46, %v3098_v44  ;;  %v3101_v50 = vpop.f32.mrb[58].mxu1  ;;  %v1330_v51 = vpack.c.bf16 %v1308_v15, %v1307_v43 }
 0x221   : > { %v3102_v52 = vpop.f32.mrb[59].mxu1 }
 0x222   : > { %v1243_v53 = vadd.f32 %v3100_v48, %v4188_v56  ;;  %v3103_v54 = vadd.f32 %v3102_v52, %v3101_v50  ;;  %3362 = vmatmul.mubr.bf16.gmra.mrb[96].mxu1 %v1330_v51 }
 0x224   : > { %v1246_v57 = vadd.f32 %v3103_v54, %v4188_v56  ;;  %v1309_v61 = vmax.f32 %v1243_v53, 0.0  ;;  %v3625_v53 = vld [vmem:[%s4483_s13] sm:$0xff]  }
 0x225   : > { %3425 = vmatprep.subr.bf16.mxu0 %v3625_v53  ;;  %v4252_v54 = vld [vmem:[%s4480_s10] ss:$0 sm:$0xff] }
 0x226   : > { %v1310_v39 = vmax.f32 %v1246_v57, 0.0  ;;  %v3104_v58 = vpop.f32.mrb[60].mxu1 }
 0x227   : > { %v3105_v55 = vpop.f32.mrb[61].mxu1 }
 0x228   : > { %v3106_v62 = vadd.f32 %v3105_v55, %v3104_v58  ;;  %v3107_v45 = vpop.f32.mrb[62].mxu1  ;;  %v1331_v63 = vpack.c.bf16 %v1310_v39, %v1309_v61 }
 0x229   : > { %v3108_v0 = vpop.f32.mrb[63].mxu1 }
 0x22a   : > { %v1251_v18 = vadd.f32 %v3106_v62, %v4188_v56  ;;  %v3109_v1 = vadd.f32 %v3108_v0, %v3107_v45  ;;  %3365 = vmatprep.mubr.bf16.mxu1 %v1331_v63 }
 0x22c   : > { %v1254_v59 = vadd.f32 %v3109_v1, %v4188_v56  ;;  %v1311_v2 = vmax.f32 %v1251_v18, 0.0 }
 0x22e   : > { %v1312_v60 = vmax.f32 %v1254_v59, 0.0  ;;  %v3110_v3 = vpop.f32.mrb[64].mxu1 }
 0x22f   : > { %v3111_v4 = vpop.f32.mrb[65].mxu1 }
 0x230   : > { %v3112_v5 = vadd.f32 %v3111_v4, %v3110_v3  ;;  %v3113_v6 = vpop.f32.mrb[66].mxu1  ;;  %v1332_v7 = vpack.c.bf16 %v1312_v60, %v1311_v2  ;;  %v3626_v60 = vld [vmem:[%s4483_s13 + $0x8] sm:$0xff]   ;;  %v3627_v3 = vld [vmem:[%s4483_s13 + $0x10] sm:$0xff]  }
 0x231   : > { %v3114_v8 = vpop.f32.mrb[67].mxu1 }
 0x232   : > { %v1259_v13 = vadd.f32 %v3112_v5, %v4188_v56  ;;  %v3115_v11 = vadd.f32 %v3114_v8, %v3113_v6  ;;  %3366 = vmatmul.mubr.bf16.gmra.mrb[100].mxu1 %v1332_v7  ;;  %v3628_v7 = vld [vmem:[%s4483_s13 + $0x18] sm:$0xff]  }
 0x234   : > { %v1262_v10 = vadd.f32 %v3115_v11, %v4188_v56  ;;  %v1313_v12 = vmax.f32 %v1259_v13, 0.0 }
 0x236   : > { %v1314_v16 = vmax.f32 %v1262_v10, 0.0  ;;  %v3116_v19 = vpop.f32.mrb[68].mxu1 }
 0x237   : > { %v3117_v21 = vpop.f32.mrb[69].mxu1 }
 0x238   : > { %v3118_v49 = vadd.f32 %v3117_v21, %v3116_v19  ;;  %v3119_v22 = vpop.f32.mrb[70].mxu1  ;;  %v1333_v23 = vpack.c.bf16 %v1314_v16, %v1313_v12 }
 0x239   : > { %v3120_v24 = vpop.f32.mrb[71].mxu1 }
 0x23a   : > { %v1267_v25 = vadd.f32 %v3118_v49, %v4188_v56  ;;  %v3121_v9 = vadd.f32 %v3120_v24, %v3119_v22  ;;  %3369 = vmatprep.mubr.bf16.mxu1 %v1333_v23  ;;  %v3630_v24 = vld [vmem:[%s4483_s13 + $0x28] sm:$0xff]  }
 0x23c   : > { %v1270_v29 = vadd.f32 %v3121_v9, %v4188_v56  ;;  %v1315_v28 = vmax.f32 %v1267_v25, 0.0 }
 0x23e   : > { %v1316_v14 = vmax.f32 %v1270_v29, 0.0  ;;  %v3122_v30 = vpop.f32.mrb[72].mxu1 }
 0x23f   : > { %v3123_v31 = vpop.f32.mrb[73].mxu1 }
 0x240   : > { %v3124_v47 = vadd.f32 %v3123_v31, %v3122_v30  ;;  %v3125_v32 = vpop.f32.mrb[74].mxu1  ;;  %v1334_v33 = vpack.c.bf16 %v1316_v14, %v1315_v28 }
 0x241   : > { %v3126_v17 = vpop.f32.mrb[75].mxu1 }
 0x242   : > { %v1275_v34 = vadd.f32 %v3124_v47, %v4188_v56  ;;  %v3127_v35 = vadd.f32 %v3126_v17, %v3125_v32  ;;  %3370 = vmatmul.mubr.bf16.gmra.mrb[104].mxu1 %v1334_v33 }
 0x244   : > { %v1278_v36 = vadd.f32 %v3127_v35, %v4188_v56  ;;  %v1317_v37 = vmax.f32 %v1275_v34, 0.0 }
 0x246   : > { %v1318_v38 = vmax.f32 %v1278_v36, 0.0  ;;  %v3128_v27 = vpop.f32.mrb[76].mxu1 }
 0x247   : > { %v3129_v41 = vpop.f32.mrb[77].mxu1 }
 0x248   : > { %v3130_v42 = vadd.f32 %v3129_v41, %v3128_v27  ;;  %v3131_v40 = vpop.f32.mrb[78].mxu1  ;;  %v1335_v43 = vpack.c.bf16 %v1318_v38, %v1317_v37 }
 0x249   : > { %v3132_v15 = vpop.f32.mrb[79].mxu1 }
 0x24a   : > { %v1283_v44 = vadd.f32 %v3130_v42, %v4188_v56  ;;  %v3133_v46 = vadd.f32 %v3132_v15, %v3131_v40  ;;  %3373 = vmatprep.mubr.bf16.mxu1 %v1335_v43 }
 0x24c   : > { %v1286_v48 = vadd.f32 %v3133_v46, %v4188_v56  ;;  %v1319_v50 = vmax.f32 %v1283_v44, 0.0 }
 0x24e   : > { %v1320_v51 = vmax.f32 %v1286_v48, 0.0 }
 0x250   : > { %v1336_v52 = vpack.c.bf16 %v1320_v51, %v1319_v50 }
 0x252   : > { %3374 = vmatmul.mubr.bf16.gmra.mrb[108].mxu1 %v1336_v52 }
 0x2b5   : > { %v3347_v57 = vpop.f32.mrb[80].mxu1 }
 0x2b6   : > { %v2178_v61 = vadd.f32 %v3347_v57, %v4252_v54  ;;  %v2042_v39 = vpop.f32.mrb[81].mxu1 }
 0x2b7   : > { %v2176_v56 = vadd.f32 %v4252_v54, %v2042_v39  ;;  %v3348_v58 = vpop.f32.mrb[82].mxu1 }
 0x2b8   : > { %v2179_v55 = vadd.f32 %v3348_v58, %v4252_v54  ;;  %v2045_v62 = vpop.f32.mrb[83].mxu1  ;;  %v2210_v63 = vmax.f32 %v2178_v61, 0.0 }
 0x2b9   : > { %v2177_v45 = vadd.f32 %v4252_v54, %v2045_v62  ;;  %v2208_v18 = vmax.f32 %v2176_v56, 0.0 }
 0x2ba   : > { %v2211_v0 = vmax.f32 %v2179_v55, 0.0 }
 0x2bb   : > { %v2209_v1 = vmax.f32 %v2177_v45, 0.0 }
 0x2bc   : > { %v2241_v59 = vpack.c.bf16 %v2211_v0, %v2210_v63 }
 0x2bd   : > { %v2240_v2 = vpack.c.bf16 %v2209_v1, %v2208_v18 }
 0x2bf   : > { %3393 = vmatprep.mubr.bf16.mxu0 %v2240_v2 }
 0x2c0   : > { %3394 = vmatmul.mubr.bf16.vlgmr.msra.gmra.mrb[80].mxu0 %v2241_v59 }
 0x2c1   : > { %3426 = vmatpush3.bf16.msra.mxu0 %v3625_v53 }
 0x2c2   : > { %3427 = vmatprep.subr.bf16.mxu0 %v3626_v60 }
 0x2c5   : > { %v3351_v4 = vpop.f32.mrb[84].mxu1  ;;  %3428 = vmatpush3.bf16.msra.mxu0 %v3626_v60 }
 0x2c6   : > { %v2182_v5 = vadd.f32 %v3351_v4, %v4252_v54  ;;  %v2058_v6 = vpop.f32.mrb[85].mxu1  ;;  %3429 = vmatprep.subr.bf16.mxu0 %v3627_v3 }
 0x2c7   : > { %v2180_v8 = vadd.f32 %v4252_v54, %v2058_v6  ;;  %v3352_v13 = vpop.f32.mrb[86].mxu1 }
 0x2c8   : > { %v2183_v11 = vadd.f32 %v3352_v13, %v4252_v54  ;;  %v2061_v10 = vpop.f32.mrb[87].mxu1  ;;  %v2214_v16 = vmax.f32 %v2182_v5, 0.0 }
 0x2c9   : > { %v2181_v12 = vadd.f32 %v4252_v54, %v2061_v10  ;;  %3430 = vmatpush3.bf16.msra.mxu0 %v3627_v3  ;;  %v2212_v21 = vmax.f32 %v2180_v8, 0.0 }
 0x2ca   : > { %v2215_v19 = vmax.f32 %v2183_v11, 0.0  ;;  %3431 = vmatprep.subr.bf16.mxu0 %v3628_v7 }
 0x2cb   : > { %v2213_v49 = vmax.f32 %v2181_v12, 0.0 }
 0x2cc   : > { %v2243_v22 = vpack.c.bf16 %v2215_v19, %v2214_v16  ;;  %v3631_v19 = vld [vmem:[%s4483_s13 + $0x30] sm:$0xff]  }
 0x2cd   : > { %v2242_v23 = vpack.c.bf16 %v2213_v49, %v2212_v21  ;;  %3432 = vmatpush3.bf16.msra.mxu0 %v3628_v7 }
 0x2ce   : > { %3433 = vmatprep.subr.bf16.mxu0 %v3629_v20 }
 0x2cf   : > { %3397 = vmatprep.mubr.bf16.mxu0 %v2242_v23 }
 0x2d0   : > { %3398 = vmatmul.mubr.bf16.gmra.mrb[84].mxu0 %v2243_v22 }
 0x2d1   : > { %3434 = vmatpush3.bf16.msra.mxu0 %v3629_v20 }
 0x2d2   : > { %3435 = vmatprep.subr.bf16.mxu0 %v3630_v24 }
 0x2d5   : > { %v3355_v25 = vpop.f32.mrb[88].mxu1  ;;  %3436 = vmatpush3.bf16.msra.mxu0 %v3630_v24 }
 0x2d6   : > { %v2186_v9 = vadd.f32 %v3355_v25, %v4252_v54  ;;  %v2074_v26 = vpop.f32.mrb[89].mxu1  ;;  %3437 = vmatprep.subr.bf16.mxu0 %v3631_v19 }
 0x2d7   : > { %v2184_v29 = vadd.f32 %v4252_v54, %v2074_v26  ;;  %v3356_v28 = vpop.f32.mrb[90].mxu1 }
 0x2d8   : > { %v2187_v14 = vadd.f32 %v3356_v28, %v4252_v54  ;;  %v2077_v30 = vpop.f32.mrb[91].mxu1  ;;  %v2218_v47 = vmax.f32 %v2186_v9, 0.0  ;;  %v3632_v9 = vld [vmem:[%s4483_s13 + $0x38] sm:$0xff]  }
 0x2d9   : > { %v2185_v31 = vadd.f32 %v4252_v54, %v2077_v30  ;;  %v2216_v33 = vmax.f32 %v2184_v29, 0.0  ;;  %3438 = vmatpush3.bf16.msra.mxu0 %v3631_v19 }
 0x2da   : > { %v2219_v32 = vmax.f32 %v2187_v14, 0.0  ;;  %3439 = vmatprep.subr.bf16.mxu0 %v3632_v9 }
 0x2db   : > { %v2217_v17 = vmax.f32 %v2185_v31, 0.0 }
 0x2dc   : > { %v2245_v34 = vpack.c.bf16 %v2219_v32, %v2218_v47 }
 0x2dd   : > { %v2244_v35 = vpack.c.bf16 %v2217_v17, %v2216_v33  ;;  %3440 = vmatpush3.bf16.msra.mxu0 %v3632_v9 }
 0x2df   : > { %3401 = vmatprep.mubr.bf16.mxu0 %v2244_v35 }
 0x2e0   : > { %3402 = vmatmul.mubr.bf16.gmra.mrb[88].mxu0 %v2245_v34 }
 0x2e5   : > { %v3359_v36 = vpop.f32.mrb[92].mxu1 }
 0x2e6   : > { %v2190_v37 = vadd.f32 %v3359_v36, %v4252_v54  ;;  %v2090_v38 = vpop.f32.mrb[93].mxu1 }
 0x2e7   : > { %v2188_v27 = vadd.f32 %v4252_v54, %v2090_v38  ;;  %v3360_v41 = vpop.f32.mrb[94].mxu1 }
 0x2e8   : > { %v2191_v42 = vadd.f32 %v3360_v41, %v4252_v54  ;;  %v2093_v40 = vpop.f32.mrb[95].mxu1  ;;  %v2222_v15 = vmax.f32 %v2190_v37, 0.0 }
 0x2e9   : > { %v2189_v43 = vadd.f32 %v4252_v54, %v2093_v40  ;;  %v2220_v46 = vmax.f32 %v2188_v27, 0.0 }
 0x2ea   : > { %v2223_v44 = vmax.f32 %v2191_v42, 0.0 }
 0x2eb   : > { %v2221_v48 = vmax.f32 %v2189_v43, 0.0 }
 0x2ec   : > { %v2247_v50 = vpack.c.bf16 %v2223_v44, %v2222_v15  ;;  %v4310_v44 = vld [vmem:[%s4482_s12] ss:$0 sm:$0xff] }
 0x2ed   : > { %v2246_v51 = vpack.c.bf16 %v2221_v48, %v2220_v46 }
 0x2ef   : > { %3405 = vmatprep.mubr.bf16.mxu0 %v2246_v51 }
 0x2f0   : > { %3406 = vmatmul.mubr.bf16.gmra.mrb[92].mxu0 %v2247_v50 }
 0x2f5   : > { %v3363_v52 = vpop.f32.mrb[96].mxu1 }
 0x2f6   : > { %v2194_v53 = vadd.f32 %v3363_v52, %v4252_v54  ;;  %v2106_v57 = vpop.f32.mrb[97].mxu1 }
 0x2f7   : > { %v2192_v61 = vadd.f32 %v4252_v54, %v2106_v57  ;;  %v3364_v39 = vpop.f32.mrb[98].mxu1 }
 0x2f8   : > { %v2195_v56 = vadd.f32 %v3364_v39, %v4252_v54  ;;  %v2109_v58 = vpop.f32.mrb[99].mxu1  ;;  %v2226_v62 = vmax.f32 %v2194_v53, 0.0 }
 0x2f9   : > { %v2193_v55 = vadd.f32 %v4252_v54, %v2109_v58  ;;  %v2224_v63 = vmax.f32 %v2192_v61, 0.0 }
 0x2fa   : > { %v2227_v45 = vmax.f32 %v2195_v56, 0.0 }
 0x2fb   : > { %v2225_v0 = vmax.f32 %v2193_v55, 0.0 }
 0x2fc   : > { %v2249_v18 = vpack.c.bf16 %v2227_v45, %v2226_v62 }
 0x2fd   : > { %v2248_v1 = vpack.c.bf16 %v2225_v0, %v2224_v63 }
 0x2ff   : > { %3409 = vmatprep.mubr.bf16.mxu0 %v2248_v1 }
 0x300   : > { %3410 = vmatmul.mubr.bf16.gmra.mrb[96].mxu0 %v2249_v18 }
 0x305   : > { %v3367_v59 = vpop.f32.mrb[100].mxu1 }
 0x306   : > { %v2198_v2 = vadd.f32 %v3367_v59, %v4252_v54  ;;  %v2122_v60 = vpop.f32.mrb[101].mxu1 }
 0x307   : > { %v2196_v3 = vadd.f32 %v4252_v54, %v2122_v60  ;;  %v3368_v4 = vpop.f32.mrb[102].mxu1 }
 0x308   : > { %v2199_v5 = vadd.f32 %v3368_v4, %v4252_v54  ;;  %v2125_v6 = vpop.f32.mrb[103].mxu1  ;;  %v2230_v8 = vmax.f32 %v2198_v2, 0.0 }
 0x309   : > { %v2197_v7 = vadd.f32 %v4252_v54, %v2125_v6  ;;  %v2228_v11 = vmax.f32 %v2196_v3, 0.0 }
 0x30a   : > { %v2231_v13 = vmax.f32 %v2199_v5, 0.0 }
 0x30b   : > { %v2229_v10 = vmax.f32 %v2197_v7, 0.0 }
 0x30c   : > { %v2251_v12 = vpack.c.bf16 %v2231_v13, %v2230_v8 }
 0x30d   : > { %v2250_v16 = vpack.c.bf16 %v2229_v10, %v2228_v11 }
 0x30f   : > { %3413 = vmatprep.mubr.bf16.mxu0 %v2250_v16 }
 0x310   : > { %3414 = vmatmul.mubr.bf16.gmra.mrb[100].mxu0 %v2251_v12 }
 0x315   : > { %v3371_v20 = vpop.f32.mrb[104].mxu1 }
 0x316   : > { %v2202_v21 = vadd.f32 %v3371_v20, %v4252_v54  ;;  %v2138_v49 = vpop.f32.mrb[105].mxu1 }
 0x317   : > { %v2200_v22 = vadd.f32 %v4252_v54, %v2138_v49  ;;  %v3372_v23 = vpop.f32.mrb[106].mxu1 }
 0x318   : > { %v2203_v24 = vadd.f32 %v3372_v23, %v4252_v54  ;;  %v2141_v25 = vpop.f32.mrb[107].mxu1  ;;  %v2234_v29 = vmax.f32 %v2202_v21, 0.0 }
 0x319   : > { %v2201_v26 = vadd.f32 %v4252_v54, %v2141_v25  ;;  %v2232_v14 = vmax.f32 %v2200_v22, 0.0 }
 0x31a   : > { %v2235_v28 = vmax.f32 %v2203_v24, 0.0 }
 0x31b   : > { %v2233_v30 = vmax.f32 %v2201_v26, 0.0 }
 0x31c   : > { %v2253_v31 = vpack.c.bf16 %v2235_v28, %v2234_v29 }
 0x31d   : > { %v2252_v47 = vpack.c.bf16 %v2233_v30, %v2232_v14 }
 0x31f   : > { %3417 = vmatprep.mubr.bf16.mxu0 %v2252_v47 }
 0x320   : > { %3418 = vmatmul.mubr.bf16.gmra.mrb[104].mxu0 %v2253_v31 }
 0x325   : > { %v3375_v32 = vpop.f32.mrb[108].mxu1 }
 0x326   : > { %v2206_v33 = vadd.f32 %v3375_v32, %v4252_v54  ;;  %v2154_v17 = vpop.f32.mrb[109].mxu1 }
 0x327   : > { %v2204_v34 = vadd.f32 %v4252_v54, %v2154_v17  ;;  %v3376_v35 = vpop.f32.mrb[110].mxu1 }
 0x328   : > { %v2207_v36 = vadd.f32 %v3376_v35, %v4252_v54  ;;  %v2157_v37 = vpop.f32.mrb[111].mxu1  ;;  %v2238_v27 = vmax.f32 %v2206_v33, 0.0 }
 0x329   : > { %v2205_v38 = vadd.f32 %v4252_v54, %v2157_v37  ;;  %v2236_v42 = vmax.f32 %v2204_v34, 0.0 }
 0x32a   : > { %v2239_v41 = vmax.f32 %v2207_v36, 0.0 }
 0x32b   : > { %v2237_v40 = vmax.f32 %v2205_v38, 0.0 }
 0x32c   : > { %v2255_v43 = vpack.c.bf16 %v2239_v41, %v2238_v27 }
 0x32d   : > { %v2254_v15 = vpack.c.bf16 %v2237_v40, %v2236_v42 }
 0x32f   : > { %3421 = vmatprep.mubr.bf16.mxu0 %v2254_v15 }
 0x330   : > { %3422 = vmatmul.mubr.bf16.gmra.mrb[108].mxu0 %v2255_v43 }
 0x393   : > { %v3395_v46 = vpop.f32.mrb[80].mxu0 }
 0x394   : > { %v2370_v48 = vadd.f32 %v3395_v46, %v4310_v44  ;;  %v2361_v50 = vpop.f32.mrb[81].mxu0 }
 0x395   : > { %v2362_v51 = vadd.f32 %v4310_v44, %v2361_v50  ;;  %v3396_v54 = vpop.f32.mrb[82].mxu0 }
 0x396   : > { %v2373_v52 = vadd.f32 %v3396_v54, %v4310_v44  ;;  %v2364_v53 = vpop.f32.mrb[83].mxu0  ;;  %v2490_v61 = vmax.f32 %v2370_v48, 0.0 }
 0x397   : > { %v2365_v57 = vadd.f32 %v4310_v44, %v2364_v53  ;;  %v2488_v56 = vmax.f32 %v2362_v51, 0.0 }
 0x398   : > { %v2491_v39 = vmax.f32 %v2373_v52, 0.0 }
 0x399   : > { %v2489_v58 = vmax.f32 %v2365_v57, 0.0 }
 0x39a   : > { %v2521_v55 = vpack.c.bf16 %v2491_v39, %v2490_v61 }
 0x39b   : > { %v2520_v62 = vpack.c.bf16 %v2489_v58, %v2488_v56 }
 0x39d   : > { %3441 = vmatprep.mubr.bf16.mxu0 %v2520_v62 }
 0x39e   : > { %3442 = vmatmul.mubr.bf16.vlgmr.msra.gmra.mrb[112].mxu0 %v2521_v55 }
 0x3a3   : > { %v3399_v45 = vpop.f32.mrb[84].mxu0 }
 0x3a4   : > { %v2386_v63 = vadd.f32 %v3399_v45, %v4310_v44  ;;  %v2377_v0 = vpop.f32.mrb[85].mxu0 }
 0x3a5   : > { %v2378_v18 = vadd.f32 %v4310_v44, %v2377_v0  ;;  %v3400_v1 = vpop.f32.mrb[86].mxu0 }
 0x3a6   : > { %v2389_v59 = vadd.f32 %v3400_v1, %v4310_v44  ;;  %v2380_v2 = vpop.f32.mrb[87].mxu0  ;;  %v2494_v3 = vmax.f32 %v2386_v63, 0.0 }
 0x3a7   : > { %v2381_v60 = vadd.f32 %v4310_v44, %v2380_v2  ;;  %v2492_v5 = vmax.f32 %v2378_v18, 0.0 }
 0x3a8   : > { %v2495_v4 = vmax.f32 %v2389_v59, 0.0 }
 0x3a9   : > { %v2493_v6 = vmax.f32 %v2381_v60, 0.0 }
 0x3aa   : > { %v2523_v7 = vpack.c.bf16 %v2495_v4, %v2494_v3 }
 0x3ab   : > { %v2522_v8 = vpack.c.bf16 %v2493_v6, %v2492_v5 }
 0x3ad   : > { %3445 = vmatprep.mubr.bf16.mxu0 %v2522_v8 }
 0x3ae   : > { %3446 = vmatmul.mubr.bf16.gmra.mrb[116].mxu0 %v2523_v7 }
 0x3b3   : > { %v3403_v13 = vpop.f32.mrb[88].mxu0 }
 0x3b4   : > { %v2402_v11 = vadd.f32 %v3403_v13, %v4310_v44  ;;  %v2393_v10 = vpop.f32.mrb[89].mxu0 }
 0x3b5   : > { %v2394_v12 = vadd.f32 %v4310_v44, %v2393_v10  ;;  %v3404_v16 = vpop.f32.mrb[90].mxu0 }
 0x3b6   : > { %v2405_v19 = vadd.f32 %v3404_v16, %v4310_v44  ;;  %v2396_v20 = vpop.f32.mrb[91].mxu0  ;;  %v2498_v49 = vmax.f32 %v2402_v11, 0.0 }
 0x3b7   : > { %v2397_v21 = vadd.f32 %v4310_v44, %v2396_v20  ;;  %v2496_v23 = vmax.f32 %v2394_v12, 0.0 }
 0x3b8   : > { %v2499_v22 = vmax.f32 %v2405_v19, 0.0 }
 0x3b9   : > { %v2497_v24 = vmax.f32 %v2397_v21, 0.0 }
 0x3ba   : > { %v2525_v25 = vpack.c.bf16 %v2499_v22, %v2498_v49 }
 0x3bb   : > { %v2524_v9 = vpack.c.bf16 %v2497_v24, %v2496_v23 }
 0x3bd   : > { %3449 = vmatprep.mubr.bf16.mxu0 %v2524_v9 }
 0x3be   : > { %3450 = vmatmul.mubr.bf16.gmra.mrb[120].mxu0 %v2525_v25 }
 0x3c3   : > { %v3407_v26 = vpop.f32.mrb[92].mxu0 }
 0x3c4   : > { %v2418_v29 = vadd.f32 %v3407_v26, %v4310_v44  ;;  %v2409_v28 = vpop.f32.mrb[93].mxu0 }
 0x3c5   : > { %v2410_v14 = vadd.f32 %v4310_v44, %v2409_v28  ;;  %v3408_v30 = vpop.f32.mrb[94].mxu0 }
 0x3c6   : > { %v2421_v31 = vadd.f32 %v3408_v30, %v4310_v44  ;;  %v2412_v47 = vpop.f32.mrb[95].mxu0  ;;  %v2502_v33 = vmax.f32 %v2418_v29, 0.0 }
 0x3c7   : > { %v2413_v32 = vadd.f32 %v4310_v44, %v2412_v47  ;;  %v2500_v34 = vmax.f32 %v2410_v14, 0.0 }
 0x3c8   : > { %v2503_v17 = vmax.f32 %v2421_v31, 0.0 }
 0x3c9   : > { %v2501_v35 = vmax.f32 %v2413_v32, 0.0  ;;  %v4350_v32 = vld [vmem:[%s4484_s14] ss:$0 sm:$0xff] }
 0x3ca   : > { %v2527_v36 = vpack.c.bf16 %v2503_v17, %v2502_v33 }
 0x3cb   : > { %v2526_v37 = vpack.c.bf16 %v2501_v35, %v2500_v34 }
 0x3cd   : > { %3453 = vmatprep.mubr.bf16.mxu0 %v2526_v37 }
 0x3ce   : > { %3454 = vmatmul.mubr.bf16.gmra.mrb[124].mxu0 %v2527_v36 }
 0x3d3   : > { %v3411_v38 = vpop.f32.mrb[96].mxu0 }
 0x3d4   : > { %v2434_v27 = vadd.f32 %v3411_v38, %v4310_v44  ;;  %v2425_v41 = vpop.f32.mrb[97].mxu0 }
 0x3d5   : > { %v2426_v42 = vadd.f32 %v4310_v44, %v2425_v41  ;;  %v3412_v40 = vpop.f32.mrb[98].mxu0 }
 0x3d6   : > { %v2437_v43 = vadd.f32 %v3412_v40, %v4310_v44  ;;  %v2428_v15 = vpop.f32.mrb[99].mxu0  ;;  %v2506_v48 = vmax.f32 %v2434_v27, 0.0 }
 0x3d7   : > { %v2429_v46 = vadd.f32 %v4310_v44, %v2428_v15  ;;  %v2504_v51 = vmax.f32 %v2426_v42, 0.0 }
 0x3d8   : > { %v2507_v50 = vmax.f32 %v2437_v43, 0.0 }
 0x3d9   : > { %v2505_v54 = vmax.f32 %v2429_v46, 0.0 }
 0x3da   : > { %v2529_v52 = vpack.c.bf16 %v2507_v50, %v2506_v48 }
 0x3db   : > { %v2528_v53 = vpack.c.bf16 %v2505_v54, %v2504_v51 }
 0x3dd   : > { %3457 = vmatprep.mubr.bf16.mxu0 %v2528_v53 }
 0x3de   : > { %3458 = vmatmul.mubr.bf16.gmra.mrb[128].mxu0 %v2529_v52 }
 0x3e3   : > { %v3415_v57 = vpop.f32.mrb[100].mxu0 }
 0x3e4   : > { %v2450_v61 = vadd.f32 %v3415_v57, %v4310_v44  ;;  %v2441_v39 = vpop.f32.mrb[101].mxu0 }
 0x3e5   : > { %v2442_v56 = vadd.f32 %v4310_v44, %v2441_v39  ;;  %v3416_v58 = vpop.f32.mrb[102].mxu0 }
 0x3e6   : > { %v2453_v55 = vadd.f32 %v3416_v58, %v4310_v44  ;;  %v2444_v62 = vpop.f32.mrb[103].mxu0  ;;  %v2510_v63 = vmax.f32 %v2450_v61, 0.0 }
 0x3e7   : > { %v2445_v45 = vadd.f32 %v4310_v44, %v2444_v62  ;;  %v2508_v18 = vmax.f32 %v2442_v56, 0.0 }
 0x3e8   : > { %v2511_v0 = vmax.f32 %v2453_v55, 0.0 }
 0x3e9   : > { %v2509_v1 = vmax.f32 %v2445_v45, 0.0 }
 0x3ea   : > { %v2531_v59 = vpack.c.bf16 %v2511_v0, %v2510_v63 }
 0x3eb   : > { %v2530_v2 = vpack.c.bf16 %v2509_v1, %v2508_v18 }
 0x3ed   : > { %3461 = vmatprep.mubr.bf16.mxu0 %v2530_v2 }
 0x3ee   : > { %3462 = vmatmul.mubr.bf16.gmra.mrb[132].mxu0 %v2531_v59 }
 0x3f3   : > { %v3419_v60 = vpop.f32.mrb[104].mxu0 }
 0x3f4   : > { %v2466_v3 = vadd.f32 %v3419_v60, %v4310_v44  ;;  %v2457_v4 = vpop.f32.mrb[105].mxu0 }
 0x3f5   : > { %v2458_v5 = vadd.f32 %v4310_v44, %v2457_v4  ;;  %v3420_v6 = vpop.f32.mrb[106].mxu0 }
 0x3f6   : > { %v2469_v7 = vadd.f32 %v3420_v6, %v4310_v44  ;;  %v2460_v8 = vpop.f32.mrb[107].mxu0  ;;  %v2514_v11 = vmax.f32 %v2466_v3, 0.0 }
 0x3f7   : > { %v2461_v13 = vadd.f32 %v4310_v44, %v2460_v8  ;;  %v2512_v12 = vmax.f32 %v2458_v5, 0.0 }
 0x3f8   : > { %v2515_v10 = vmax.f32 %v2469_v7, 0.0 }
 0x3f9   : > { %v2513_v16 = vmax.f32 %v2461_v13, 0.0 }
 0x3fa   : > { %v2533_v19 = vpack.c.bf16 %v2515_v10, %v2514_v11 }
 0x3fb   : > { %v2532_v20 = vpack.c.bf16 %v2513_v16, %v2512_v12 }
 0x3fd   : > { %3465 = vmatprep.mubr.bf16.mxu0 %v2532_v20 }
 0x3fe   : > { %3466 = vmatmul.mubr.bf16.gmra.mrb[136].mxu0 %v2533_v19 }
 0x403   : > { %v3423_v21 = vpop.f32.mrb[108].mxu0 }
 0x404   : > { %v2482_v49 = vadd.f32 %v3423_v21, %v4310_v44  ;;  %v2473_v22 = vpop.f32.mrb[109].mxu0 }
 0x405   : > { %v2474_v23 = vadd.f32 %v4310_v44, %v2473_v22  ;;  %v3424_v24 = vpop.f32.mrb[110].mxu0 }
 0x406   : > { %v2485_v25 = vadd.f32 %v3424_v24, %v4310_v44  ;;  %v2476_v9 = vpop.f32.mrb[111].mxu0  ;;  %v2518_v29 = vmax.f32 %v2482_v49, 0.0 }
 0x407   : > { %v2477_v26 = vadd.f32 %v4310_v44, %v2476_v9  ;;  %v2516_v14 = vmax.f32 %v2474_v23, 0.0 }
 0x408   : > { %v2519_v28 = vmax.f32 %v2485_v25, 0.0 }
 0x409   : > { %v2517_v30 = vmax.f32 %v2477_v26, 0.0 }
 0x40a   : > { %v2535_v31 = vpack.c.bf16 %v2519_v28, %v2518_v29 }
 0x40b   : > { %v2534_v47 = vpack.c.bf16 %v2517_v30, %v2516_v14 }
 0x40d   : > { %3469 = vmatprep.mubr.bf16.mxu0 %v2534_v47 }
 0x40e   : > { %3470 = vmatmul.mubr.bf16.gmra.mrb[140].mxu0 %v2535_v31 }
 0x471   : > { %v3443_v33 = vpop.f32.mrb[112].mxu0 }
 0x472   : > { %v2650_v17 = vadd.f32 %v3443_v33, %v4350_v32  ;;  %v2641_v44 = vpop.f32.mrb[113].mxu0 }
 0x473   : > { %v2642_v34 = vadd.f32 %v4350_v32, %v2641_v44  ;;  %v3444_v35 = vpop.f32.mrb[114].mxu0 }
 0x474   : > { %2770 = vst [vmem:[%s4354_s27 + $0x10] sm:$0xff] %v2650_v17  ;;  %v2653_v36 = vadd.f32 %v3444_v35, %v4350_v32  ;;  %v2644_v37 = vpop.f32.mrb[115].mxu0 }
 0x475   : > { %2768 = vst [vmem:[%s4354_s27] sm:$0xff] %v2642_v34  ;;  %v2645_v38 = vadd.f32 %v4350_v32, %v2644_v37 }
 0x476   : > { %2771 = vst [vmem:[%s4354_s27 + $0x18] sm:$0xff] %v2653_v36 }
 0x477   : > { %2769 = vst [vmem:[%s4354_s27 + $0x8] sm:$0xff] %v2645_v38 }
 0x481   : > { %v3447_v27 = vpop.f32.mrb[116].mxu0 }
 0x482   : > { %v2666_v41 = vadd.f32 %v3447_v27, %v4350_v32  ;;  %v2657_v42 = vpop.f32.mrb[117].mxu0 }
 0x483   : > { %v2658_v40 = vadd.f32 %v4350_v32, %v2657_v42  ;;  %v3448_v43 = vpop.f32.mrb[118].mxu0 }
 0x484   : > { %2774 = vst [vmem:[%s4354_s27 + $0x30] sm:$0xff] %v2666_v41  ;;  %v2669_v15 = vadd.f32 %v3448_v43, %v4350_v32  ;;  %v2660_v46 = vpop.f32.mrb[119].mxu0 }
 0x485   : > { %2772 = vst [vmem:[%s4354_s27 + $0x20] sm:$0xff] %v2658_v40  ;;  %v2661_v48 = vadd.f32 %v4350_v32, %v2660_v46 }
 0x486   : > { %2775 = vst [vmem:[%s4354_s27 + $0x38] sm:$0xff] %v2669_v15 }
 0x487   : > { %2773 = vst [vmem:[%s4354_s27 + $0x28] sm:$0xff] %v2661_v48 }
 0x491   : > { %v3451_v50 = vpop.f32.mrb[120].mxu0 }
 0x492   : > { %v2682_v51 = vadd.f32 %v3451_v50, %v4350_v32  ;;  %v2673_v54 = vpop.f32.mrb[121].mxu0 }
 0x493   : > { %v2674_v52 = vadd.f32 %v4350_v32, %v2673_v54  ;;  %v3452_v53 = vpop.f32.mrb[122].mxu0 }
 0x494   : > { %2778 = vst [vmem:[%s4354_s27 + $0x50] sm:$0xff] %v2682_v51  ;;  %v2685_v57 = vadd.f32 %v3452_v53, %v4350_v32  ;;  %v2676_v61 = vpop.f32.mrb[123].mxu0 }
 0x495   : > { %2776 = vst [vmem:[%s4354_s27 + $0x40] sm:$0xff] %v2674_v52  ;;  %v2677_v39 = vadd.f32 %v4350_v32, %v2676_v61 }
 0x496   : > { %2779 = vst [vmem:[%s4354_s27 + $0x58] sm:$0xff] %v2685_v57 }
 0x497   : > { %2777 = vst [vmem:[%s4354_s27 + $0x48] sm:$0xff] %v2677_v39 }
 0x4a1   : > { %v3455_v56 = vpop.f32.mrb[124].mxu0 }
 0x4a2   : > { %v2698_v58 = vadd.f32 %v3455_v56, %v4350_v32  ;;  %v2689_v55 = vpop.f32.mrb[125].mxu0 }
 0x4a3   : > { %v2690_v62 = vadd.f32 %v4350_v32, %v2689_v55  ;;  %v3456_v45 = vpop.f32.mrb[126].mxu0 }
 0x4a4   : > { %2782 = vst [vmem:[%s4354_s27 + $0x70] sm:$0xff] %v2698_v58  ;;  %v2701_v63 = vadd.f32 %v3456_v45, %v4350_v32  ;;  %v2692_v0 = vpop.f32.mrb[127].mxu0 }
 0x4a5   : > { %2780 = vst [vmem:[%s4354_s27 + $0x60] sm:$0xff] %v2690_v62  ;;  %v2693_v18 = vadd.f32 %v4350_v32, %v2692_v0 }
 0x4a6   : > { %2783 = vst [vmem:[%s4354_s27 + $0x78] sm:$0xff] %v2701_v63 }
 0x4a7   : > { %2781 = vst [vmem:[%s4354_s27 + $0x68] sm:$0xff] %v2693_v18 }
 0x4b1   : > { %v3459_v1 = vpop.f32.mrb[128].mxu0 }
 0x4b2   : > { %v2714_v59 = vadd.f32 %v3459_v1, %v4350_v32  ;;  %v2705_v2 = vpop.f32.mrb[129].mxu0 }
 0x4b3   : > { %v2706_v60 = vadd.f32 %v4350_v32, %v2705_v2  ;;  %v3460_v3 = vpop.f32.mrb[130].mxu0 }
 0x4b4   : > { %2786 = vst [vmem:[%s4354_s27 + $0x90] sm:$0xff] %v2714_v59  ;;  %v2717_v4 = vadd.f32 %v3460_v3, %v4350_v32  ;;  %v2708_v5 = vpop.f32.mrb[131].mxu0 }
 0x4b5   : > { %2784 = vst [vmem:[%s4354_s27 + $0x80] sm:$0xff] %v2706_v60  ;;  %v2709_v6 = vadd.f32 %v4350_v32, %v2708_v5 }
 0x4b6   : > { %2787 = vst [vmem:[%s4354_s27 + $0x98] sm:$0xff] %v2717_v4 }
 0x4b7   : > { %2785 = vst [vmem:[%s4354_s27 + $0x88] sm:$0xff] %v2709_v6 }
 0x4c1   : > { %v3463_v7 = vpop.f32.mrb[132].mxu0 }
 0x4c2   : > { %v2730_v8 = vadd.f32 %v3463_v7, %v4350_v32  ;;  %v2721_v13 = vpop.f32.mrb[133].mxu0 }
 0x4c3   : > { %v2722_v11 = vadd.f32 %v4350_v32, %v2721_v13  ;;  %v3464_v10 = vpop.f32.mrb[134].mxu0 }
 0x4c4   : > { %2790 = vst [vmem:[%s4354_s27 + $0xb0] sm:$0xff] %v2730_v8  ;;  %v2733_v12 = vadd.f32 %v3464_v10, %v4350_v32  ;;  %v2724_v16 = vpop.f32.mrb[135].mxu0 }
 0x4c5   : > { %2788 = vst [vmem:[%s4354_s27 + $0xa0] sm:$0xff] %v2722_v11  ;;  %v2725_v19 = vadd.f32 %v4350_v32, %v2724_v16 }
 0x4c6   : > { %2791 = vst [vmem:[%s4354_s27 + $0xb8] sm:$0xff] %v2733_v12 }
 0x4c7   : > { %2789 = vst [vmem:[%s4354_s27 + $0xa8] sm:$0xff] %v2725_v19 }
 0x4d1   : > { %v3467_v20 = vpop.f32.mrb[136].mxu0 }
 0x4d2   : > { %v2746_v21 = vadd.f32 %v3467_v20, %v4350_v32  ;;  %v2737_v49 = vpop.f32.mrb[137].mxu0 }
 0x4d3   : > { %v2738_v22 = vadd.f32 %v4350_v32, %v2737_v49  ;;  %v3468_v23 = vpop.f32.mrb[138].mxu0 }
 0x4d4   : > { %2794 = vst [vmem:[%s4354_s27 + $0xd0] sm:$0xff] %v2746_v21  ;;  %v2749_v24 = vadd.f32 %v3468_v23, %v4350_v32  ;;  %v2740_v25 = vpop.f32.mrb[139].mxu0 }
 0x4d5   : > { %2792 = vst [vmem:[%s4354_s27 + $0xc0] sm:$0xff] %v2738_v22  ;;  %v2741_v9 = vadd.f32 %v4350_v32, %v2740_v25 }
 0x4d6   : > { %2795 = vst [vmem:[%s4354_s27 + $0xd8] sm:$0xff] %v2749_v24 }
 0x4d7   : > { %2793 = vst [vmem:[%s4354_s27 + $0xc8] sm:$0xff] %v2741_v9 }
 0x4e1   : > { %v3471_v26 = vpop.f32.mrb[140].mxu0 }
 0x4e2   : > { %v2762_v29 = vadd.f32 %v3471_v26, %v4350_v32  ;;  %v2753_v28 = vpop.f32.mrb[141].mxu0 }
 0x4e3   : > { %v2754_v14 = vadd.f32 %v4350_v32, %v2753_v28  ;;  %v3472_v30 = vpop.f32.mrb[142].mxu0 }
 0x4e4   : > { %2798 = vst [vmem:[%s4354_s27 + $0xf0] sm:$0xff] %v2762_v29  ;;  %v2765_v31 = vadd.f32 %v3472_v30, %v4350_v32  ;;  %v2756_v47 = vpop.f32.mrb[143].mxu0 }
 0x4e5   : > { %2796 = vst [vmem:[%s4354_s27 + $0xe0] sm:$0xff] %v2754_v14  ;;  %v2757_v33 = vadd.f32 %v4350_v32, %v2756_v47 }
 0x4e6   : > { %2799 = vst [vmem:[%s4354_s27 + $0xf8] sm:$0xff] %v2765_v31 }
 0x4e7   : > { %2797 = vst [vmem:[%s4354_s27 + $0xe8] sm:$0xff] %v2757_v33 }
 0x4e8   : > { %3646 = shalt.err (!%p3643_p3)
}
 0x4e9   : > { %s3647_s25 = scalar_lea.hbm %s4419_s26, 4096  ;;  %s3651_s17 = scalar_lea.hbm %s4485_s15, 8192 }
 0x4ea   : > { %p3648_p4 = scmp.ne.s32.totalorder %s4419_s26, %s3647_s25  ;;  %p3652_p9 = scmp.lt.u32.totalorder %s4419_s26, %s4485_s15 }
 0x4eb   : > { %p3653_p10 = scmp.lt.u32.totalorder %s3651_s17, %s3647_s25  ;;  %p3655_p12 = scmp.lt.u32.totalorder %s3647_s25, %s4419_s26 }
 0x4ec   : > { %p3649_p7 = pnand %p3648_p4, %p3819_p5 }
 0x4ed   : > { %p3654_p11 = por %p3653_p10, %p3652_p9 }
 0x4ee   : > { %p3650_p8 = pneg %p3649_p7 }
 0x4ef   : > { %p3656_p13 = por %p3655_p12, %p3654_p11 }
 0x4f1   : > { %p3657_p0 = pnand %p3656_p13, %p3650_p8 }
 0x4f3   : > { %3660 = shalt.err (!%p3657_p0)
}
 0x4f4   : > { %s3699_s30 = smov 128   ;;  %s3700_s0 = smov 8  }
 0x4f5   : > { %3508 = dma.vmem_to_hbm [thread:$0]  (%p3819_p5), %s4421_s2, 4096, %s4419_s26, %s4429_s22, %s3699_s30, %s3699_s30, %s3700_s0  }
 0x4f6 PF: > { %p3514_p1 = scmp.ge.s32.totalorder %s3695_s21, 2  ;;  %s2829_s27 = sand.u32 1, %s3683_s18  }
 0x4f7   : > { %s2830_s25 = scalar_lea.sflag [#allocation3], %s2829_s27 }
 0x4f8   : > { %p3511_p2 = pnand %p3514_p1, %p3823_p6 }
 0x4fa   : > { %3678 = dma.done.wait (!%p3511_p2), %s2830_s25, 4096  }
 0x4fb   : > { %3680 = vsyncadd (!%p3511_p2), %s2830_s25, 4294963200  ;;  %s4495_s23 = sld [smem:[#allocation5_spill]]  ;;  %s4496_s20 = sld [smem:[#allocation6_spill]] }
 0x4fc   : > { %p25_p3 = scmp.ge.s32.totalorder %s3806_s24, 4   ;;  %s4497_s18 = smov %s3687_s19 }
 0x4fd   : > { %s4499_s21 = smov %s3806_s24 }
 0x4fe   :  { %27 = sbr.rel (!%p25_p3) target bundleno = 6 (0x6), region = 118 }
 0x501   : > { %s4498_s19 = smov %s4495_s23 }
 0x505   :  { %2835 = vsyncpa [#allocation3], 1 }
 0x506   :  { %2837 = vsyncpa [#allocation3 + $0x1], 1 }

</bundles_post_ra>
